<compile_context>
chip_gen: v6e
topology: v6e:2x2x1
jax: 0.10.0
libtpu: 0.0.40
codegen_flags: <defaults>
</compile_context>

<pallas_src>
import jax
import jax.numpy as jnp
from jax.experimental import pallas as pl
from jax.experimental.pallas import tpu as pltpu


def _round_up(x, m):
    return ((x + m - 1) // m) * m


def _stable_softplus(s):
    # softplus(s) = log(1 + exp(s)) without overflow for large s.
    return jnp.maximum(s, 0.0) + jnp.log1p(jnp.exp(-jnp.abs(s)))


def bayesian_linear_kernel(x_ref, w_mu_ref, w_sigma_ref, b_mu_ref, b_sigma_ref,
                           eps_w_ref, eps_b_ref, out_ref,
                           w_samp_ref, b_samp_ref):
    # Hoisted reparameterization + one-time transpose: compute the sampled
    # weights once at the start of each shard's sequential inner axis and keep
    # them resident in VMEM, already transposed to (in_p, out_p) so the
    # per-tile matmul below is a canonical MXU contraction.
    @pl.when(pl.program_id(1) == 0)
    def _():
        w = w_mu_ref[...] + _stable_softplus(w_sigma_ref[...]) * eps_w_ref[...]
        w_samp_ref[...] = w.T.astype(w_samp_ref.dtype)
        b_samp_ref[...] = (b_mu_ref[...]
                           + _stable_softplus(b_sigma_ref[...]) * eps_b_ref[...])

    acc = jnp.dot(x_ref[...].astype(w_samp_ref.dtype), w_samp_ref[...],
                  preferred_element_type=jnp.float32)
    out_ref[...] = (acc + b_samp_ref[...]).astype(out_ref.dtype)


def bayesian_linear_forward(x, w_mu, w_sigma, b_mu, b_sigma, eps_w, eps_b, *,
                            block_batch=256, num_shards=1, matmul_dtype=None,
                            single_buffer_params=True):
    batch, in_dim = x.shape
    out_dim = w_mu.shape[0]
    if matmul_dtype is None:
        matmul_dtype = x.dtype

    # ---- Lane-dense padding: last dims up to multiples of 128. -------------
    # Zero padding is matmul-neutral: padded x columns are zero, padded W
    # rows/cols contribute zero, padded output columns are sliced off below.
    in_p = _round_up(in_dim, 128)
    out_p = _round_up(out_dim, 128)

    def pad2(a, rows, cols):
        pr, pc = rows - a.shape[0], cols - a.shape[1]
        if pr or pc:
            a = jnp.pad(a, ((0, pr), (0, pc)))
        return a

    w_mu_p = pad2(w_mu, out_p, in_p)
    w_sigma_p = pad2(w_sigma, out_p, in_p)
    eps_w_p = pad2(eps_w, out_p, in_p)
    b_mu_p = pad2(b_mu.reshape(1, out_dim), 1, out_p)
    b_sigma_p = pad2(b_sigma.reshape(1, out_dim), 1, out_p)
    eps_b_p = pad2(eps_b.reshape(1, out_dim), 1, out_p)

    # ---- Batch tiling (minimal padding, shard only when it pays off). ------
    sub = 16 if x.dtype == jnp.bfloat16 else 8       # sublane tiling of x
    use_shards = num_shards > 1 and batch >= num_shards * block_batch
    n_outer = num_shards if use_shards else 1
    rows_per_shard = pl.cdiv(batch, n_outer)
    if rows_per_shard <= block_batch:
        n_inner = 1
        bb = _round_up(rows_per_shard, sub)
    else:
        n_inner = pl.cdiv(rows_per_shard, block_batch)
        bb = _round_up(pl.cdiv(rows_per_shard, n_inner), sub)
    padded_batch = n_outer * n_inner * bb
    x_p = pad2(x, padded_batch, in_p)

    # ---- Block specs. -------------------------------------------------------
    pm = pl.Buffered(1) if single_buffer_params else None

    def param_spec(shape):
        # Grid-invariant inputs: constant index_map; single-buffer them to
        # avoid doubling resident VMEM for weight-sized arrays.
        if pm is None:
            return pl.BlockSpec(shape, lambda o, i: (0, 0))
        return pl.BlockSpec(shape, lambda o, i: (0, 0), pipeline_mode=pm)

    x_spec = pl.BlockSpec((bb, in_p), lambda o, i: (o * n_inner + i, 0))
    out_spec = pl.BlockSpec((bb, out_p), lambda o, i: (o * n_inner + i, 0))

    out = pl.pallas_call(
        bayesian_linear_kernel,
        out_shape=jax.ShapeDtypeStruct((padded_batch, out_p), x.dtype),
        grid_spec=pltpu.PrefetchScalarGridSpec(
            num_scalar_prefetch=0,
            grid=(n_outer, n_inner),
            in_specs=[
                x_spec,
                param_spec((out_p, in_p)),   # w_mu
                param_spec((out_p, in_p)),   # w_sigma
                param_spec((1, out_p)),      # b_mu
                param_spec((1, out_p)),      # b_sigma
                param_spec((out_p, in_p)),   # eps_w
                param_spec((1, out_p)),      # eps_b
            ],
            out_specs=out_spec,
            scratch_shapes=[
                pltpu.VMEM((in_p, out_p), matmul_dtype),  # sampled W, transposed
                pltpu.VMEM((1, out_p), jnp.float32),      # sampled bias
            ],
        ),
        compiler_params=pltpu.CompilerParams(
            dimension_semantics=("parallel", "arbitrary")),
    )(x_p, w_mu_p, w_sigma_p, b_mu_p, b_sigma_p, eps_w_p, eps_b_p)

    return out[:batch, :out_dim]


if __name__ == "__main__":
    # Small shapes consistent with the module: [batch, in_dim] -> [batch, out_dim].
    batch, in_dim, out_dim = 48, 32, 24

    key = jax.random.PRNGKey(0)
    k_wm, k_ws, k_bm, k_bs, k_x, k_ew, k_eb = jax.random.split(key, 7)

    # Deterministic parameter init mirroring __init__:
    #   w_mu, b_mu ~ N(0, 0.1); w_sigma, b_sigma = log(exp(0.1)-1) + N(0, 0.1)
    softplus_inv_01 = jnp.log(jnp.exp(jnp.float32(0.1)) - 1.0)
    w_mu = 0.1 * jax.random.normal(k_wm, (out_dim, in_dim), jnp.float32)
    w_sigma = softplus_inv_01 + 0.1 * jax.random.normal(
        k_ws, (out_dim, in_dim), jnp.float32)
    b_mu = 0.1 * jax.random.normal(k_bm, (out_dim,), jnp.float32)
    b_sigma = softplus_inv_01 + 0.1 * jax.random.normal(
        k_bs, (out_dim,), jnp.float32)

    # Input and the per-forward Gaussian noise (torch.randn_like equivalents).
    x = jax.random.normal(k_x, (batch, in_dim), jnp.float32)
    eps_w = jax.random.normal(k_ew, (out_dim, in_dim), jnp.float32)
    eps_b = jax.random.normal(k_eb, (out_dim,), jnp.float32)

    # Pure-JAX reference.
    w_s = w_mu + _stable_softplus(w_sigma) * eps_w
    b_s = b_mu + _stable_softplus(b_sigma) * eps_b
    ref_f32 = x @ w_s.T + b_s

    def run(**kw):
        try:
            return bayesian_linear_forward(x, w_mu, w_sigma, b_mu, b_sigma,
                                           eps_w, eps_b, **kw)
        except Exception:
            # Safety net: if this jax build rejects pipeline_mode=pl.Buffered(1)
            # on pallas_call inputs, fall back to default double-buffering.
            kw = dict(kw, single_buffer_params=False)
            return bayesian_linear_forward(x, w_mu, w_sigma, b_mu, b_sigma,
                                           eps_w, eps_b, **kw)

    # 1) f32 matmul path: single shard, whole batch in one lane-dense tile.
    out = jax.block_until_ready(run())
    assert out.shape == (batch, out_dim)
    assert jnp.allclose(out, ref_f32, atol=1e-4, rtol=1e-4)

    # 2) Multi-tile grid (2 shards x 2 inner tiles, batch padding, hoisted
    #    scratch reuse across grid steps) with bf16 MXU operands / f32 accum,
    #    as recommended for v5e/v6e/v7x.
    out_bf16 = jax.block_until_ready(
        run(block_batch=16, num_shards=2, matmul_dtype=jnp.bfloat16))
    ref_bf16 = jnp.dot(x.astype(jnp.bfloat16), w_s.astype(jnp.bfloat16).T,
                       preferred_element_type=jnp.float32) + b_s
    assert out_bf16.shape == (batch, out_dim)
    assert jnp.allclose(out_bf16, ref_bf16, atol=1e-2, rtol=1e-2)

    print("KERNEL_OK")
</pallas_src>

<mosaic_0001>
module attributes {stable_mosaic.version = 11 : i64} {
  func.func @bayesian_linear_kernel(%arg0: i32, %arg1: i32, %arg2: memref<48x128xf32, #tpu.memory_space<vmem>>, %arg3: memref<128x128xf32, #tpu.memory_space<vmem>>, %arg4: memref<128x128xf32, #tpu.memory_space<vmem>>, %arg5: memref<1x128xf32, #tpu.memory_space<vmem>>, %arg6: memref<1x128xf32, #tpu.memory_space<vmem>>, %arg7: memref<128x128xf32, #tpu.memory_space<vmem>>, %arg8: memref<1x128xf32, #tpu.memory_space<vmem>>, %arg9: memref<48x128xf32, #tpu.memory_space<vmem>>, %arg10: memref<128x128xf32, #tpu.memory_space<vmem>>, %arg11: memref<1x128xf32, #tpu.memory_space<vmem>>) attributes {dimension_semantics = [#tpu.dimension_semantics<parallel>, #tpu.dimension_semantics<arbitrary>], iteration_bounds = array<i64: 1, 1>, scalar_prefetch = 0 : i64, scratch_operands = 2 : i64, tpu.core_type = #tpu.core_type<tc>, window_params = [{transform_indices = @transform_0, window_bounds = array<i64: 48, 128>}, {pipeline_mode = #tpu.pipeline_mode<synchronous>, transform_indices = @transform_1, window_bounds = array<i64: 128, 128>}, {pipeline_mode = #tpu.pipeline_mode<synchronous>, transform_indices = @transform_2, window_bounds = array<i64: 128, 128>}, {pipeline_mode = #tpu.pipeline_mode<synchronous>, transform_indices = @transform_3, window_bounds = array<i64: 1, 128>}, {pipeline_mode = #tpu.pipeline_mode<synchronous>, transform_indices = @transform_4, window_bounds = array<i64: 1, 128>}, {pipeline_mode = #tpu.pipeline_mode<synchronous>, transform_indices = @transform_5, window_bounds = array<i64: 128, 128>}, {pipeline_mode = #tpu.pipeline_mode<synchronous>, transform_indices = @transform_6, window_bounds = array<i64: 1, 128>}, {transform_indices = @transform_7, window_bounds = array<i64: 48, 128>}]} {
    %c0_i32 = arith.constant 0 : i32
    %0 = arith.cmpi eq, %arg1, %c0_i32 : i32
    %1 = arith.extui %0 : i1 to i32
    %c0_i32_0 = arith.constant 0 : i32
    %2 = arith.cmpi ne, %1, %c0_i32_0 : i32
    scf.if %2 {
      %c0_8 = arith.constant 0 : index
      %c0_9 = arith.constant 0 : index
      %10 = vector.load %arg3[%c0_8, %c0_9] : memref<128x128xf32, #tpu.memory_space<vmem>>, vector<128x128xf32>
      %c0_10 = arith.constant 0 : index
      %c0_11 = arith.constant 0 : index
      %11 = vector.load %arg4[%c0_10, %c0_11] : memref<128x128xf32, #tpu.memory_space<vmem>>, vector<128x128xf32>
      %cst_12 = arith.constant 0.000000e+00 : f32
      %12 = vector.broadcast %cst_12 : f32 to vector<128x128xf32>
      %13 = arith.maximumf %11, %12 : vector<128x128xf32>
      %14 = math.absf %11 : vector<128x128xf32>
      %cst_13 = arith.constant 0.000000e+00 : f32
      %15 = vector.broadcast %cst_13 : f32 to vector<128x128xf32>
      %16 = arith.subf %15, %14 : vector<128x128xf32>
      %17 = math.exp %16 : vector<128x128xf32>
      %18 = math.log1p %17 : vector<128x128xf32>
      %19 = arith.addf %13, %18 : vector<128x128xf32>
      %c0_14 = arith.constant 0 : index
      %c0_15 = arith.constant 0 : index
      %20 = vector.load %arg7[%c0_14, %c0_15] : memref<128x128xf32, #tpu.memory_space<vmem>>, vector<128x128xf32>
      %21 = arith.mulf %19, %20 : vector<128x128xf32>
      %22 = arith.addf %10, %21 : vector<128x128xf32>
      %23 = tpu.transpose %22, [1, 0] : vector<128x128xf32> -> vector<128x128xf32>
      %c0_16 = arith.constant 0 : index
      %c0_17 = arith.constant 0 : index
      %24 = vector.load %arg10[%c0_16, %c0_17] : memref<128x128xf32, #tpu.memory_space<vmem>>, vector<128x128xf32>
      tpu.vector_store %arg10[%c0_16, %c0_17], %23 {strides = array<i32>} : memref<128x128xf32, #tpu.memory_space<vmem>>, vector<128x128xf32>,
      %c0_18 = arith.constant 0 : index
      %c0_19 = arith.constant 0 : index
      %25 = vector.load %arg5[%c0_18, %c0_19] : memref<1x128xf32, #tpu.memory_space<vmem>>, vector<1x128xf32>
      %c0_20 = arith.constant 0 : index
      %c0_21 = arith.constant 0 : index
      %26 = vector.load %arg6[%c0_20, %c0_21] : memref<1x128xf32, #tpu.memory_space<vmem>>, vector<1x128xf32>
      %cst_22 = arith.constant 0.000000e+00 : f32
      %27 = vector.broadcast %cst_22 : f32 to vector<1x128xf32>
      %28 = arith.maximumf %26, %27 : vector<1x128xf32>
      %29 = math.absf %26 : vector<1x128xf32>
      %cst_23 = arith.constant 0.000000e+00 : f32
      %30 = vector.broadcast %cst_23 : f32 to vector<1x128xf32>
      %31 = arith.subf %30, %29 : vector<1x128xf32>
      %32 = math.exp %31 : vector<1x128xf32>
      %33 = math.log1p %32 : vector<1x128xf32>
      %34 = arith.addf %28, %33 : vector<1x128xf32>
      %c0_24 = arith.constant 0 : index
      %c0_25 = arith.constant 0 : index
      %35 = vector.load %arg8[%c0_24, %c0_25] : memref<1x128xf32, #tpu.memory_space<vmem>>, vector<1x128xf32>
      %36 = arith.mulf %34, %35 : vector<1x128xf32>
      %37 = arith.addf %25, %36 : vector<1x128xf32>
      %c0_26 = arith.constant 0 : index
      %c0_27 = arith.constant 0 : index
      %38 = vector.load %arg11[%c0_26, %c0_27] : memref<1x128xf32, #tpu.memory_space<vmem>>, vector<1x128xf32>
      tpu.vector_store %arg11[%c0_26, %c0_27], %37 {strides = array<i32>} : memref<1x128xf32, #tpu.memory_space<vmem>>, vector<1x128xf32>,
    } else {
    }
    %c0 = arith.constant 0 : index
    %c0_1 = arith.constant 0 : index
    %3 = vector.load %arg2[%c0, %c0_1] : memref<48x128xf32, #tpu.memory_space<vmem>>, vector<48x128xf32>
    %c0_2 = arith.constant 0 : index
    %c0_3 = arith.constant 0 : index
    %4 = vector.load %arg10[%c0_2, %c0_3] : memref<128x128xf32, #tpu.memory_space<vmem>>, vector<128x128xf32>
    %cst = arith.constant dense<0.000000e+00> : vector<48x128xf32>
    %5 = tpu.matmul %3, %4, %cst {dimension_numbers = #tpu.dot_dimension_numbers<[1], [0], [0], [1], [0, 0, 1, 1], [], []>} : vector<48x128xf32>, vector<128x128xf32>, vector<48x128xf32> -> vector<48x128xf32>
    %c0_4 = arith.constant 0 : index
    %c0_5 = arith.constant 0 : index
    %6 = vector.load %arg11[%c0_4, %c0_5] : memref<1x128xf32, #tpu.memory_space<vmem>>, vector<1x128xf32>
    %7 = vector.broadcast %6 : vector<1x128xf32> to vector<48x128xf32>
    %8 = arith.addf %5, %7 : vector<48x128xf32>
    %c0_6 = arith.constant 0 : index
    %c0_7 = arith.constant 0 : index
    %9 = vector.load %arg9[%c0_6, %c0_7] : memref<48x128xf32, #tpu.memory_space<vmem>>, vector<48x128xf32>
    tpu.vector_store %arg9[%c0_6, %c0_7], %8 {strides = array<i32>} : memref<48x128xf32, #tpu.memory_space<vmem>>, vector<48x128xf32>,
    return
  }
  func.func @transform_0(%arg0: i32, %arg1: i32) -> (i32, i32) {
    %c1_i32 = arith.constant 1 : i32
    %0 = arith.muli %arg0, %c1_i32 : i32
    %1 = arith.addi %0, %arg1 : i32
    %c0_i32 = arith.constant 0 : i32
    %c0_i32_0 = arith.constant 0 : i32
    return %1, %c0_i32 : i32, i32
  }
  func.func @transform_1(%arg0: i32, %arg1: i32) -> (i32, i32) {
    %c0_i32 = arith.constant 0 : i32
    %c0_i32_0 = arith.constant 0 : i32
    %c0_i32_1 = arith.constant 0 : i32
    return %c0_i32, %c0_i32_0 : i32, i32
  }
  func.func @transform_2(%arg0: i32, %arg1: i32) -> (i32, i32) {
    %c0_i32 = arith.constant 0 : i32
    %c0_i32_0 = arith.constant 0 : i32
    %c0_i32_1 = arith.constant 0 : i32
    return %c0_i32, %c0_i32_0 : i32, i32
  }
  func.func @transform_3(%arg0: i32, %arg1: i32) -> (i32, i32) {
    %c0_i32 = arith.constant 0 : i32
    %c0_i32_0 = arith.constant 0 : i32
    %c0_i32_1 = arith.constant 0 : i32
    return %c0_i32, %c0_i32_0 : i32, i32
  }
  func.func @transform_4(%arg0: i32, %arg1: i32) -> (i32, i32) {
    %c0_i32 = arith.constant 0 : i32
    %c0_i32_0 = arith.constant 0 : i32
    %c0_i32_1 = arith.constant 0 : i32
    return %c0_i32, %c0_i32_0 : i32, i32
  }
  func.func @transform_5(%arg0: i32, %arg1: i32) -> (i32, i32) {
    %c0_i32 = arith.constant 0 : i32
    %c0_i32_0 = arith.constant 0 : i32
    %c0_i32_1 = arith.constant 0 : i32
    return %c0_i32, %c0_i32_0 : i32, i32
  }
  func.func @transform_6(%arg0: i32, %arg1: i32) -> (i32, i32) {
    %c0_i32 = arith.constant 0 : i32
    %c0_i32_0 = arith.constant 0 : i32
    %c0_i32_1 = arith.constant 0 : i32
    return %c0_i32, %c0_i32_0 : i32, i32
  }
  func.func @transform_7(%arg0: i32, %arg1: i32) -> (i32, i32) {
    %c1_i32 = arith.constant 1 : i32
    %0 = arith.muli %arg0, %c1_i32 : i32
    %1 = arith.addi %0, %arg1 : i32
    %c0_i32 = arith.constant 0 : i32
    %c0_i32_0 = arith.constant 0 : i32
    return %1, %c0_i32 : i32, i32
  }
}

module attributes {stable_mosaic.version = 11 : i64} {
  func.func @bayesian_linear_kernel(%arg0: i32, %arg1: i32, %arg2: memref<48x128xf32, #tpu.memory_space<vmem>>, %arg3: memref<128x128xf32, #tpu.memory_space<vmem>>, %arg4: memref<128x128xf32, #tpu.memory_space<vmem>>, %arg5: memref<1x128xf32, #tpu.memory_space<vmem>>, %arg6: memref<1x128xf32, #tpu.memory_space<vmem>>, %arg7: memref<128x128xf32, #tpu.memory_space<vmem>>, %arg8: memref<1x128xf32, #tpu.memory_space<vmem>>, %arg9: memref<48x128xf32, #tpu.memory_space<vmem>>, %arg10: memref<128x128xf32, #tpu.memory_space<vmem>>, %arg11: memref<1x128xf32, #tpu.memory_space<vmem>>) attributes {dimension_semantics = [#tpu.dimension_semantics<parallel>, #tpu.dimension_semantics<arbitrary>], iteration_bounds = array<i64: 1, 1>, scalar_prefetch = 0 : i64, scratch_operands = 2 : i64, tpu.core_type = #tpu.core_type<tc>, window_params = [{transform_indices = @transform_0, window_bounds = array<i64: 48, 128>}, {pipeline_mode = #tpu.pipeline_mode<synchronous>, transform_indices = @transform_1, window_bounds = array<i64: 128, 128>}, {pipeline_mode = #tpu.pipeline_mode<synchronous>, transform_indices = @transform_2, window_bounds = array<i64: 128, 128>}, {pipeline_mode = #tpu.pipeline_mode<synchronous>, transform_indices = @transform_3, window_bounds = array<i64: 1, 128>}, {pipeline_mode = #tpu.pipeline_mode<synchronous>, transform_indices = @transform_4, window_bounds = array<i64: 1, 128>}, {pipeline_mode = #tpu.pipeline_mode<synchronous>, transform_indices = @transform_5, window_bounds = array<i64: 128, 128>}, {pipeline_mode = #tpu.pipeline_mode<synchronous>, transform_indices = @transform_6, window_bounds = array<i64: 1, 128>}, {transform_indices = @transform_7, window_bounds = array<i64: 48, 128>}]} {
    %c0_i32 = arith.constant 0 : i32
    %0 = arith.cmpi eq, %arg1, %c0_i32 : i32
    %1 = arith.extui %0 : i1 to i32
    %c0_i32_0 = arith.constant 0 : i32
    %2 = arith.cmpi ne, %1, %c0_i32_0 : i32
    scf.if %2 {
      %c0_8 = arith.constant 0 : index
      %c0_9 = arith.constant 0 : index
      %10 = vector.load %arg3[%c0_8, %c0_9] : memref<128x128xf32, #tpu.memory_space<vmem>>, vector<128x128xf32>
      %c0_10 = arith.constant 0 : index
      %c0_11 = arith.constant 0 : index
      %11 = vector.load %arg4[%c0_10, %c0_11] : memref<128x128xf32, #tpu.memory_space<vmem>>, vector<128x128xf32>
      %cst_12 = arith.constant 0.000000e+00 : f32
      %12 = vector.broadcast %cst_12 : f32 to vector<128x128xf32>
      %13 = arith.maximumf %11, %12 : vector<128x128xf32>
      %14 = math.absf %11 : vector<128x128xf32>
      %cst_13 = arith.constant 0.000000e+00 : f32
      %15 = vector.broadcast %cst_13 : f32 to vector<128x128xf32>
      %16 = arith.subf %15, %14 : vector<128x128xf32>
      %17 = math.exp %16 : vector<128x128xf32>
      %18 = math.log1p %17 : vector<128x128xf32>
      %19 = arith.addf %13, %18 : vector<128x128xf32>
      %c0_14 = arith.constant 0 : index
      %c0_15 = arith.constant 0 : index
      %20 = vector.load %arg7[%c0_14, %c0_15] : memref<128x128xf32, #tpu.memory_space<vmem>>, vector<128x128xf32>
      %21 = arith.mulf %19, %20 : vector<128x128xf32>
      %22 = arith.addf %10, %21 : vector<128x128xf32>
      %23 = tpu.transpose %22, [1, 0] : vector<128x128xf32> -> vector<128x128xf32>
      %c0_16 = arith.constant 0 : index
      %c0_17 = arith.constant 0 : index
      %24 = vector.load %arg10[%c0_16, %c0_17] : memref<128x128xf32, #tpu.memory_space<vmem>>, vector<128x128xf32>
      tpu.vector_store %arg10[%c0_16, %c0_17], %23 {strides = array<i32>} : memref<128x128xf32, #tpu.memory_space<vmem>>, vector<128x128xf32>,
      %c0_18 = arith.constant 0 : index
      %c0_19 = arith.constant 0 : index
      %25 = vector.load %arg5[%c0_18, %c0_19] : memref<1x128xf32, #tpu.memory_space<vmem>>, vector<1x128xf32>
      %c0_20 = arith.constant 0 : index
      %c0_21 = arith.constant 0 : index
      %26 = vector.load %arg6[%c0_20, %c0_21] : memref<1x128xf32, #tpu.memory_space<vmem>>, vector<1x128xf32>
      %cst_22 = arith.constant 0.000000e+00 : f32
      %27 = vector.broadcast %cst_22 : f32 to vector<1x128xf32>
      %28 = arith.maximumf %26, %27 : vector<1x128xf32>
      %29 = math.absf %26 : vector<1x128xf32>
      %cst_23 = arith.constant 0.000000e+00 : f32
      %30 = vector.broadcast %cst_23 : f32 to vector<1x128xf32>
      %31 = arith.subf %30, %29 : vector<1x128xf32>
      %32 = math.exp %31 : vector<1x128xf32>
      %33 = math.log1p %32 : vector<1x128xf32>
      %34 = arith.addf %28, %33 : vector<1x128xf32>
      %c0_24 = arith.constant 0 : index
      %c0_25 = arith.constant 0 : index
      %35 = vector.load %arg8[%c0_24, %c0_25] : memref<1x128xf32, #tpu.memory_space<vmem>>, vector<1x128xf32>
      %36 = arith.mulf %34, %35 : vector<1x128xf32>
      %37 = arith.addf %25, %36 : vector<1x128xf32>
      %c0_26 = arith.constant 0 : index
      %c0_27 = arith.constant 0 : index
      %38 = vector.load %arg11[%c0_26, %c0_27] : memref<1x128xf32, #tpu.memory_space<vmem>>, vector<1x128xf32>
      tpu.vector_store %arg11[%c0_26, %c0_27], %37 {strides = array<i32>} : memref<1x128xf32, #tpu.memory_space<vmem>>, vector<1x128xf32>,
    } else {
    }
    %c0 = arith.constant 0 : index
    %c0_1 = arith.constant 0 : index
    %3 = vector.load %arg2[%c0, %c0_1] : memref<48x128xf32, #tpu.memory_space<vmem>>, vector<48x128xf32>
    %c0_2 = arith.constant 0 : index
    %c0_3 = arith.constant 0 : index
    %4 = vector.load %arg10[%c0_2, %c0_3] : memref<128x128xf32, #tpu.memory_space<vmem>>, vector<128x128xf32>
    %cst = arith.constant dense<0.000000e+00> : vector<48x128xf32>
    %5 = tpu.matmul %3, %4, %cst {dimension_numbers = #tpu.dot_dimension_numbers<[1], [0], [0], [1], [0, 0, 1, 1], [], []>} : vector<48x128xf32>, vector<128x128xf32>, vector<48x128xf32> -> vector<48x128xf32>
    %c0_4 = arith.constant 0 : index
    %c0_5 = arith.constant 0 : index
    %6 = vector.load %arg11[%c0_4, %c0_5] : memref<1x128xf32, #tpu.memory_space<vmem>>, vector<1x128xf32>
    %7 = vector.broadcast %6 : vector<1x128xf32> to vector<48x128xf32>
    %8 = arith.addf %5, %7 : vector<48x128xf32>
    %c0_6 = arith.constant 0 : index
    %c0_7 = arith.constant 0 : index
    %9 = vector.load %arg9[%c0_6, %c0_7] : memref<48x128xf32, #tpu.memory_space<vmem>>, vector<48x128xf32>
    tpu.vector_store %arg9[%c0_6, %c0_7], %8 {strides = array<i32>} : memref<48x128xf32, #tpu.memory_space<vmem>>, vector<48x128xf32>,
    return
  }
  func.func @transform_0(%arg0: i32, %arg1: i32) -> (i32, i32) {
    %c1_i32 = arith.constant 1 : i32
    %0 = arith.muli %arg0, %c1_i32 : i32
    %1 = arith.addi %0, %arg1 : i32
    %c0_i32 = arith.constant 0 : i32
    %c0_i32_0 = arith.constant 0 : i32
    return %1, %c0_i32 : i32, i32
  }
  func.func @transform_1(%arg0: i32, %arg1: i32) -> (i32, i32) {
    %c0_i32 = arith.constant 0 : i32
    %c0_i32_0 = arith.constant 0 : i32
    %c0_i32_1 = arith.constant 0 : i32
    return %c0_i32, %c0_i32_0 : i32, i32
  }
  func.func @transform_2(%arg0: i32, %arg1: i32) -> (i32, i32) {
    %c0_i32 = arith.constant 0 : i32
    %c0_i32_0 = arith.constant 0 : i32
    %c0_i32_1 = arith.constant 0 : i32
    return %c0_i32, %c0_i32_0 : i32, i32
  }
  func.func @transform_3(%arg0: i32, %arg1: i32) -> (i32, i32) {
    %c0_i32 = arith.constant 0 : i32
    %c0_i32_0 = arith.constant 0 : i32
    %c0_i32_1 = arith.constant 0 : i32
    return %c0_i32, %c0_i32_0 : i32, i32
  }
  func.func @transform_4(%arg0: i32, %arg1: i32) -> (i32, i32) {
    %c0_i32 = arith.constant 0 : i32
    %c0_i32_0 = arith.constant 0 : i32
    %c0_i32_1 = arith.constant 0 : i32
    return %c0_i32, %c0_i32_0 : i32, i32
  }
  func.func @transform_5(%arg0: i32, %arg1: i32) -> (i32, i32) {
    %c0_i32 = arith.constant 0 : i32
    %c0_i32_0 = arith.constant 0 : i32
    %c0_i32_1 = arith.constant 0 : i32
    return %c0_i32, %c0_i32_0 : i32, i32
  }
  func.func @transform_6(%arg0: i32, %arg1: i32) -> (i32, i32) {
    %c0_i32 = arith.constant 0 : i32
    %c0_i32_0 = arith.constant 0 : i32
    %c0_i32_1 = arith.constant 0 : i32
    return %c0_i32, %c0_i32_0 : i32, i32
  }
  func.func @transform_7(%arg0: i32, %arg1: i32) -> (i32, i32) {
    %c1_i32 = arith.constant 1 : i32
    %0 = arith.muli %arg0, %c1_i32 : i32
    %1 = arith.addi %0, %arg1 : i32
    %c0_i32 = arith.constant 0 : i32
    %c0_i32_0 = arith.constant 0 : i32
    return %1, %c0_i32 : i32, i32
  }
}

</mosaic_0001>

<bundles_post_ra>
// kernel: tpu_custom_call.1
= control target key start
LH: loop header
LB: loop body
LE: loop exit
PB: predicated region body
PF: predicated region fallthrough
CT: control target
= control target key end

     0   :  { %12 = vsyncpa [#allocation5], 0  ;;  %s1245_s0 = inlined_call_operand.hbm [shape: f32[48,128], index: 0, kind: input, shape index: {}]   ;;  %s1246_s1 = inlined_call_operand.hbm [shape: f32[128,128], index: 1, kind: input, shape index: {}]   ;;  %s1247_s2 = inlined_call_operand.hbm [shape: f32[128,128], index: 2, kind: input, shape index: {}]   ;;  %s1248_s3 = inlined_call_operand.vmem [shape: f32[1,128], index: 3, kind: input, shape index: {}]   ;;  %s1249_s4 = inlined_call_operand.vmem [shape: f32[1,128], index: 4, kind: input, shape index: {}]   ;;  %s1250_s5 = inlined_call_operand.hbm [shape: f32[128,128], index: 5, kind: input, shape index: {}]   ;;  %s1251_s6 = inlined_call_operand.vmem [shape: f32[1,128], index: 6, kind: input, shape index: {}]   ;;  %s1252_s7 = inlined_call_operand.hbm [shape: f32[48,128], index: 7, kind: output, shape index: {}]  }
   0x1   :  { %13 = vsyncpa [#allocation8], 0 }
   0x2   :  { %14 = vsyncpa [#allocation11], 0 }
   0x3   :  { %15 = vsyncpa [#allocation6], 0  ;;  %s915_s24 = smov [#allocation7]   ;;  %s916_s26 = smov [#allocation4]  }
   0x4   :  { %s37_s25 = sshll.u32 %s915_s24, 4  ;;  %s25_s27 = sshll.u32 %s916_s26, 4  ;;  %s38_s25 = int_to_ptr.vmem [resolvable:$true] %s37_s25  ;;  %s26_s27 = int_to_ptr.vmem [resolvable:$true] %s25_s27 }
   0x5   :  { %s815_s28 = scalar_lea.vmem %s38_s25, 2048  ;;  %p820_p1 = scmp.lt.s32.totalorder %s38_s25, %s38_s25 }
   0x6   :  { %p816_p0 = scmp.ne.s32.totalorder %s38_s25, %s815_s28  ;;  %p821_p2 = scmp.lt.s32.totalorder %s815_s28, %s815_s28 }
   0x8   :  { %p822_p3 = por %p821_p2, %p820_p1 }
   0xa   :  { %p823_p4 = pnand %p822_p3, %p816_p0 }
   0xc   :  { %826 = shalt.err (!%p823_p4)
}
   0xd   :  { %s917_s29 = smov 128   ;;  %s918_s30 = smov 8  }
   0xe   :  { %43 = dma.hbm_to_vmem [thread:$0]  %s1246_s1, 2048, %s38_s25, [#allocation8], %s917_s29, %s917_s29, %s918_s30  }
   0xf   :  { %s835_s10 = scalar_lea.vmem %s26_s27, 768  ;;  %p840_p6 = scmp.lt.s32.totalorder %s26_s27, %s26_s27 }
  0x10   :  { %p836_p5 = scmp.ne.s32.totalorder %s26_s27, %s835_s10  ;;  %p841_p7 = scmp.lt.s32.totalorder %s835_s10, %s835_s10 }
  0x12   :  { %p842_p8 = por %p841_p7, %p840_p6 }
  0x14   :  { %p843_p9 = pnand %p842_p8, %p836_p5 }
  0x16   :  { %846 = shalt.err (!%p843_p9)
}
  0x17   :  { %31 = dma.hbm_to_vmem [thread:$0]  %s1245_s0, 768, %s26_s27, [#allocation5], %s917_s29, %s917_s29, %s918_s30  }
  0x18   :  { %s919_s13 = smov [#allocation9]   ;;  %s920_s15 = smov [#allocation10]  }
  0x19   :  { %s49_s14 = sshll.u32 %s919_s13, 4  ;;  %s65_s16 = sshll.u32 %s920_s15, 4  ;;  %s50_s14 = int_to_ptr.vmem [resolvable:$true] %s49_s14  ;;  %s66_s16 = int_to_ptr.vmem [resolvable:$true] %s65_s16 }
  0x1a   :  { %s855_s1 = scalar_lea.vmem %s50_s14, 2048  ;;  %p860_p11 = scmp.lt.s32.totalorder %s50_s14, %s50_s14 }
  0x1b   :  { %p856_p10 = scmp.ne.s32.totalorder %s50_s14, %s855_s1  ;;  %p861_p12 = scmp.lt.s32.totalorder %s855_s1, %s855_s1 }
  0x1d   :  { %p862_p13 = por %p861_p12, %p860_p11 }
  0x1f   :  { %p863_p0 = pnand %p862_p13, %p856_p10 }
  0x21   :  { %866 = shalt.err (!%p863_p0)
}
  0x22   :  { %55 = dma.hbm_to_vmem [thread:$0]  %s1247_s2, 2048, %s50_s14, [#allocation8], %s917_s29, %s917_s29, %s918_s30  }
  0x23   :  { %s875_s0 = scalar_lea.vmem %s66_s16, 2048  ;;  %p880_p2 = scmp.lt.s32.totalorder %s66_s16, %s66_s16 }
  0x24   :  { %p876_p1 = scmp.ne.s32.totalorder %s66_s16, %s875_s0  ;;  %p881_p3 = scmp.lt.s32.totalorder %s875_s0, %s875_s0 }
  0x26   :  { %p882_p4 = por %p881_p3, %p880_p2 }
  0x28   :  { %p883_p5 = pnand %p882_p4, %p876_p1 }
  0x2a   :  { %886 = shalt.err (!%p883_p5)
}
  0x2b   :  { %71 = dma.hbm_to_vmem [thread:$0]  %s1250_s5, 2048, %s66_s16, [#allocation11], %s917_s29, %s917_s29, %s918_s30  }
  0x2c   :  { %907 = dma.done.wait [#allocation5], 768  }
  0x2d   :  { %908 = vsyncadd [#allocation5], 4294966528 }
  0x2e   :  { %909 = dma.done.wait [#allocation8], 4096  }
  0x2f   :  { %910 = vsyncadd [#allocation8], 4294963200 }
  0x30   :  { %911 = dma.done.wait [#allocation11], 2048  }
  0x31   :  { %912 = vsyncadd [#allocation11], 4294965248  ;;  %v986_v0 = vld [vmem:[#allocation9] sm:$0xff]  ;;  %v989_v2 = vld [vmem:[#allocation9 + $0x8] sm:$0xff] }
  0x32   :  { %v142_v1 = vand.u32 2147483647, %v986_v0  ;;  %v143_v3 = vand.u32 2147483647, %v989_v2  ;;  %v992_v4 = vld [vmem:[#allocation9 + $0x10] sm:$0xff]  ;;  %v995_v7 = vld [vmem:[#allocation9 + $0x18] sm:$0xff] }
  0x33   :  { %v144_v6 = vand.u32 2147483647, %v992_v4  ;;  %v145_v9 = vand.u32 2147483647, %v995_v7  ;;  %v998_v12 = vld [vmem:[#allocation9 + $0x20] sm:$0xff]  ;;  %v1001_v17 = vld [vmem:[#allocation9 + $0x28] sm:$0xff] }
  0x34   :  { %v158_v5 = vsub.f32 0.0, %v142_v1  ;;  %v159_v8 = vsub.f32 0.0, %v143_v3  ;;  %v146_v15 = vand.u32 2147483647, %v998_v12  ;;  %v1003_v20 = vld [vmem:[#allocation9 + $0x30] sm:$0xff]  ;;  %v1007_v24 = vld [vmem:[#allocation9 + $0x38] sm:$0xff] }
  0x35   :  { %v160_v11 = vsub.f32 0.0, %v144_v6  ;;  %v161_v14 = vsub.f32 0.0, %v145_v9  ;;  %v147_v21 = vand.u32 2147483647, %v1001_v17  ;;  %v148_v22 = vand.u32 2147483647, %v1003_v20 }
  0x36   :  { %v174_v10 = vmul.f32 1.442695, %v158_v5  ;;  %v176_v13 = vmul.f32 1.442695, %v159_v8  ;;  %v162_v19 = vsub.f32 0.0, %v146_v15  ;;  %v1010_v28 = vld [vmem:[#allocation9 + $0x40] sm:$0xff] }
  0x37   :  { %v178_v16 = vmul.f32 1.442695, %v160_v11  ;;  %v180_v18 = vmul.f32 1.442695, %v161_v14  ;;  %v163_v25 = vsub.f32 0.0, %v147_v21  ;;  %v164_v26 = vsub.f32 0.0, %v148_v22 }
  0x38   :  { %739 = vpow2.f32 %v174_v10  ;;  %v182_v23 = vmul.f32 1.442695, %v162_v19  ;;  %v149_v27 = vand.u32 2147483647, %v1007_v24  ;;  %v150_v29 = vand.u32 2147483647, %v1010_v28 }
  0x39   :  { %741 = vpow2.f32 %v176_v13  ;;  %v1013_v30 = vld [vmem:[#allocation9 + $0x48] sm:$0xff]  ;;  %v184_v31 = vmul.f32 1.442695, %v163_v25  ;;  %v186_v32 = vmul.f32 1.442695, %v164_v26  ;;  %v1016_v36 = vld [vmem:[#allocation9 + $0x50] sm:$0xff] }
  0x3a   :  { %743 = vpow2.f32 %v178_v16  ;;  %v165_v33 = vsub.f32 0.0, %v149_v27  ;;  %v166_v34 = vsub.f32 0.0, %v150_v29  ;;  %v151_v35 = vand.u32 2147483647, %v1013_v30  ;;  %v1021_v50 = vld [vmem:[#allocation9 + $0x58] sm:$0xff]  ;;  %v1035_v1 = vld [vmem:[#allocation9 + $0x60] sm:$0xff] }
  0x3b   :  { %745 = vpow2.f32 %v180_v18  ;;  %v152_v38 = vand.u32 2147483647, %v1016_v36  ;;  %v153_v54 = vand.u32 2147483647, %v1021_v50  ;;  %v126_v58 = vmax.f32 %v986_v0, 0.0  ;;  %v1041_v11 = vld [vmem:[#allocation9 + $0x68] sm:$0xff] }
  0x3c   :  { %747 = vpow2.f32 %v182_v23  ;;  %v188_v37 = vmul.f32 1.442695, %v165_v33  ;;  %v190_v39 = vmul.f32 1.442695, %v166_v34  ;;  %v167_v40 = vsub.f32 0.0, %v151_v35 }
  0x3d   :  { %749 = vpow2.f32 %v184_v31  ;;  %v168_v42 = vsub.f32 0.0, %v152_v38  ;;  %v127_v61 = vmax.f32 %v989_v2, 0.0  ;;  %v128_v5 = vmax.f32 %v992_v4, 0.0 }
  0x3e   :  { %751 = vpow2.f32 %v186_v32  ;;  %v192_v47 = vmul.f32 1.442695, %v167_v40  ;;  %v129_v6 = vmax.f32 %v995_v7, 0.0  ;;  %v169_v8 = vsub.f32 0.0, %v153_v54 }
  0x3f   :  { %753 = vpow2.f32 %v188_v37  ;;  %v194_v51 = vmul.f32 1.442695, %v168_v42  ;;  %v154_v16 = vand.u32 2147483647, %v1035_v1  ;;  %v130_v21 = vmax.f32 %v998_v12, 0.0  ;;  %v369_v42 = vld [vmem:[#allocation10 + $0x18] sm:$0xff] }
  0x40   :  { %755 = vpow2.f32 %v190_v39  ;;  %v196_v23 = vmul.f32 1.442695, %v169_v8  ;;  %v155_v25 = vand.u32 2147483647, %v1041_v11 }
  0x45   :  { %v740_v41 = vpop.eup %739 }
  0x46   :  { %v742_v43 = vpop.eup %741  ;;  %v206_v44 = vadd.f32 1.0, %v740_v41  ;;  %v209_v55 = vmul.f32 -0.5, %v740_v41  ;;  %v212_v3 = vand.u32 2147483647, %v740_v41 }
  0x47   :  { %v744_v45 = vpop.eup %743  ;;  %v215_v46 = vadd.f32 1.0, %v742_v43  ;;  %v218_v59 = vmul.f32 -0.5, %v742_v43  ;;  %v221_v14 = vand.u32 2147483647, %v742_v43 }
  0x48   :  { %v1019_v48 = vpop.eup %745  ;;  %757 = vlog2.f32 %v206_v44  ;;  %v224_v49 = vadd.f32 1.0, %v744_v45  ;;  %v227_v62 = vmul.f32 -0.5, %v744_v45  ;;  %v210_v9 = vadd.f32 1.0, %v209_v55 }
  0x49   :  { %759 = vlog2.f32 %v215_v46  ;;  %v1023_v52 = vpop.eup %747  ;;  %v233_v53 = vadd.f32 1.0, %v1019_v48  ;;  %v236_v0 = vmul.f32 -0.5, %v1019_v48  ;;  %v219_v13 = vadd.f32 1.0, %v218_v59 }
  0x4a   :  { %761 = vlog2.f32 %v224_v49  ;;  %v242_v56 = vadd.f32 1.0, %v1023_v52  ;;  %v1028_v57 = vpop.eup %749  ;;  %v245_v15 = vmul.f32 -0.5, %v1023_v52  ;;  %v228_v4 = vadd.f32 1.0, %v227_v62 }
  0x4b   :  { %763 = vpow2.f32 %v192_v47  ;;  %v1031_v60 = vpop.eup %751  ;;  %v251_v63 = vadd.f32 1.0, %v1028_v57  ;;  %v230_v18 = vand.u32 2147483647, %v744_v45  ;;  %v239_v19 = vand.u32 2147483647, %v1019_v48 }
  0x4c   :  { %765 = vlog2.f32 %v233_v53  ;;  %v260_v10 = vadd.f32 1.0, %v1031_v60  ;;  %v1043_v2 = vpop.eup %753  ;;  %vm1049_vm0 = vcmp.lt.f32.partialorder %v212_v3, 0.0004427343  ;;  %v211_v27 = vmul.f32 %v740_v41, %v210_v9  ;;  %v366_v53 = vld [vmem:[#allocation10] sm:$0xff] }
  0x4d   :  { %767 = vpow2.f32 %v194_v51  ;;  %v1054_v26 = vpop.eup %755  ;;  %v237_v29 = vadd.f32 1.0, %v236_v0  ;;  %v269_v31 = vadd.f32 1.0, %v1043_v2  ;;  %v220_v33 = vmul.f32 %v742_v43, %v219_v13  ;;  %v94_v0 = vld [vmem:[#allocation7] sm:$0xff] }
  0x4e   :  { %769 = vlog2.f32 %v242_v56  ;;  %vm1057_vm1 = vcmp.lt.f32.partialorder %v221_v14, 0.0004427343  ;;  %v246_v35 = vadd.f32 1.0, %v245_v15  ;;  %v254_v37 = vmul.f32 -0.5, %v1028_v57 }
  0x4f   :  { %771 = vlog2.f32 %v251_v63  ;;  %v229_v40 = vmul.f32 %v744_v45, %v228_v4  ;;  %vm1062_vm2 = vcmp.lt.f32.partialorder %v230_v18, 0.0004427343  ;;  %vm1066_vm3 = vcmp.lt.f32.partialorder %v239_v19, 0.0004427343  ;;  %v367_v63 = vld [vmem:[#allocation10 + $0x8] sm:$0xff] }
  0x50   :  { %773 = vlog2.f32 %v260_v10  ;;  %v248_v46 = vand.u32 2147483647, %v1023_v52  ;;  %v278_v47 = vadd.f32 1.0, %v1054_v26  ;;  %v170_v49 = vsub.f32 0.0, %v154_v16  ;;  %v95_v18 = vld [vmem:[#allocation7 + $0x8] sm:$0xff] }
  0x51   :  { %v238_v55 = vmul.f32 %v1019_v48, %v237_v29  ;;  %775 = vlog2.f32 %v269_v31  ;;  %v247_v3 = vmul.f32 %v1023_v52, %v246_v35  ;;  %v255_v8 = vadd.f32 1.0, %v254_v37  ;;  %v368_v52 = vld [vmem:[#allocation10 + $0x10] sm:$0xff] }
  0x52   :  { %v263_v48 = vmul.f32 -0.5, %v1031_v60  ;;  %777 = vlog2.f32 %v278_v47  ;;  %vm1088_vm4 = vcmp.lt.f32.partialorder %v248_v46, 0.0004427343  ;;  %v272_v37 = vmul.f32 -0.5, %v1043_v2 }
  0x53   :  { %779 = vpow2.f32 %v196_v23  ;;  %v256_v34 = vmul.f32 %v1028_v57, %v255_v8  ;;  %v96_v23 = vld [vmem:[#allocation7 + $0x10] sm:$0xff]  ;;  %v266_v7 = vand.u32 2147483647, %v1031_v60  ;;  %v133_v31 = vmax.f32 %v1007_v24, 0.0 }
  0x54   :  { %v264_v35 = vadd.f32 1.0, %v263_v48  ;;  %v273_v8 = vadd.f32 1.0, %v272_v37  ;;  %v372_v24 = vld [vmem:[#allocation10 + $0x30] sm:$0xff] }
  0x55   :  { %v758_v32 = vpop.eup %757  ;;  %vm1121_vm6 = vcmp.lt.f32.partialorder %v266_v7, 0.0004427343 }
  0x56   :  { %v760_v38 = vpop.eup %759  ;;  %v208_v39 = vmul.f32 0.6931472, %v758_v32  ;;  %v257_v32 = vand.u32 2147483647, %v1028_v57  ;;  %v1103_v57 = vld [vmem:[#allocation9 + $0x70] sm:$0xff] }
  0x57   :  { %v762_v44 = vpop.eup %761  ;;  %v217_v43 = vmul.f32 0.6931472, %v760_v38 }
  0x58   :  { %v1072_v51 = vpop.eup %763  ;;  %v214_v45 = vsel %vm1049_vm0, %v211_v27, %v208_v39  ;;  %v226_v54 = vmul.f32 0.6931472, %v762_v44  ;;  %vm1105_vm5 = vcmp.lt.f32.partialorder %v257_v32, 0.0004427343  ;;  %v284_v32 = vand.u32 2147483647, %v1054_v26 }
  0x59   :  { %v766_v56 = vpop.eup %765  ;;  %v350_v59 = vadd.f32 %v214_v45, %v126_v58  ;;  %v223_v62 = vsel %vm1057_vm1, %v220_v33, %v217_v43  ;;  %v287_v4 = vadd.f32 1.0, %v1072_v51  ;;  %v131_v33 = vmax.f32 %v1001_v17, 0.0 }
  0x5a   :  { %v1080_v9 = vpop.eup %767  ;;  %v351_v10 = vadd.f32 %v223_v62, %v127_v61  ;;  %v232_v13 = vsel %vm1062_vm2, %v229_v40, %v226_v54  ;;  %v235_v14 = vmul.f32 0.6931472, %v766_v56  ;;  %v198_v43 = vmul.f32 1.442695, %v170_v49  ;;  %v97_v62 = vld [vmem:[#allocation7 + $0x18] sm:$0xff] }
  0x5b   :  { %v770_v15 = vpop.eup %769  ;;  %v382_v16 = vmul.f32 %v366_v53, %v350_v59  ;;  %v352_v58 = vadd.f32 %v232_v13, %v128_v5  ;;  %v296_v5 = vadd.f32 1.0, %v1080_v9  ;;  %781 = vlog2.f32 %v287_v4  ;;  %v1116_v59 = vld [vmem:[#allocation9 + $0x78] sm:$0xff] }
  0x5c   :  { %v383_v19 = vmul.f32 %v367_v63, %v351_v10  ;;  %v241_v22 = vsel %vm1066_vm3, %v238_v55, %v235_v14  ;;  %v244_v27 = vmul.f32 0.6931472, %v770_v15  ;;  %v772_v61 = vpop.eup %771  ;;  %v171_v17 = vsub.f32 0.0, %v155_v25  ;;  %v370_v63 = vld [vmem:[#allocation10 + $0x20] sm:$0xff] }
  0x5d   :  { %v398_v29 = vadd.f32 %v382_v16, %v94_v0  ;;  %v384_v39 = vmul.f32 %v368_v52, %v352_v58  ;;  %v353_v40 = vadd.f32 %v241_v22, %v129_v6  ;;  %v253_v44 = vmul.f32 0.6931472, %v772_v61  ;;  %v774_v46 = vpop.eup %773 }
  0x5e   :  { %v399_v38 = vadd.f32 %v383_v19, %v95_v18  ;;  %v250_v41 = vsel %vm1088_vm4, %v247_v3, %v244_v27  ;;  %v275_v6 = vand.u32 2147483647, %v1043_v2  ;;  %783 = vlog2.f32 %v296_v5  ;;  %v776_v0 = vpop.eup %775  ;;  %v371_v19 = vld [vmem:[#allocation10 + $0x28] sm:$0xff] }
  0x5f   :  { %414 = vxpose.xlu0.b32.start [1/16] %v398_v29, 128  ;;  %v265_v45 = vmul.f32 %v1031_v60, %v264_v35  ;;  %v281_v53 = vmul.f32 -0.5, %v1054_v26  ;;  %785 = vpow2.f32 %v198_v43  ;;  %v200_v49 = vmul.f32 1.442695, %v171_v17  ;;  %v778_v18 = vpop.eup %777 }
  0x60   :  { %v400_v25 = vadd.f32 %v384_v39, %v96_v23  ;;  %v385_v54 = vmul.f32 %v369_v42, %v353_v40  ;;  %v354_v55 = vadd.f32 %v250_v41, %v130_v21  ;;  %v156_v56 = vand.u32 2147483647, %v1103_v57  ;;  %v1134_v29 = vpop.eup %779  ;;  %v99_v42 = vld [vmem:[#allocation7 + $0x28] sm:$0xff] }
  0x61   :  { %v259_v3 = vsel %vm1105_vm5, %v256_v34, %v253_v44  ;;  %v262_v60 = vmul.f32 0.6931472, %v774_v46  ;;  %787 = vpow2.f32 %v200_v49  ;;  %v132_v10 = vmax.f32 %v1003_v20, 0.0  ;;  %v98_v20 = vld [vmem:[#allocation7 + $0x20] sm:$0xff] }
  0x62   :  { %v282_v12 = vadd.f32 1.0, %v281_v53  ;;  %v290_v21 = vmul.f32 -0.5, %v1072_v51  ;;  %v172_v14 = vsub.f32 0.0, %v156_v56  ;;  %v157_v48 = vand.u32 2147483647, %v1116_v59 }
  0x63   :  { %415 = vxpose.xlu0.b32.cont [2/16] %v399_v38, 128  ;;  %v401_v15 = vadd.f32 %v385_v54, %v97_v62  ;;  %v386_v16 = vmul.f32 %v370_v63, %v354_v55  ;;  %v355_v58 = vadd.f32 %v259_v3, %v131_v33  ;;  %vm1127_vm7 = vcmp.lt.f32.partialorder %v275_v6, 0.0004427343  ;;  %v100_v54 = vld [vmem:[#allocation7 + $0x30] sm:$0xff]  ;;  %v373_v55 = vld [vmem:[#allocation10 + $0x38] sm:$0xff] }
  0x64   :  { %v268_v52 = vsel %vm1121_vm6, %v265_v45, %v262_v60  ;;  %v271_v22 = vmul.f32 0.6931472, %v776_v0  ;;  %v274_v27 = vmul.f32 %v1043_v2, %v273_v8  ;;  %v202_v61 = vmul.f32 1.442695, %v172_v14  ;;  %v374_v14 = vld [vmem:[#allocation10 + $0x40] sm:$0xff] }
  0x65   :  { %v293_v5 = vand.u32 2147483647, %v1072_v51  ;;  %v173_v33 = vsub.f32 0.0, %v157_v48  ;;  %v283_v34 = vmul.f32 %v1054_v26, %v282_v12  ;;  %v291_v35 = vadd.f32 1.0, %v290_v21  ;;  %v101_v21 = vld [vmem:[#allocation7 + $0x38] sm:$0xff] }
  0x66   :  { %v299_v37 = vmul.f32 -0.5, %v1080_v9  ;;  %v305_v38 = vadd.f32 1.0, %v1134_v29  ;;  %v402_v23 = vadd.f32 %v386_v16, %v98_v20  ;;  %v387_v2 = vmul.f32 %v371_v19, %v355_v58  ;;  %v106_v58 = vld [vmem:[#allocation7 + $0x60] sm:$0xff] }
  0x67   :  { %416 = vxpose.xlu0.b32.cont [3/16] %v400_v25, 128  ;;  %v356_v39 = vadd.f32 %v268_v52, %v132_v10  ;;  %789 = vpow2.f32 %v202_v61  ;;  %v277_v41 = vsel %vm1127_vm7, %v274_v27, %v271_v22  ;;  %v280_v44 = vmul.f32 0.6931472, %v778_v18  ;;  %v375_v52 = vld [vmem:[#allocation10 + $0x48] sm:$0xff] }
  0x68   :  { %v782_v40 = vpop.eup %781  ;;  %791 = vlog2.f32 %v305_v38  ;;  %v204_v43 = vmul.f32 1.442695, %v173_v33  ;;  %vm1144_vm8 = vcmp.lt.f32.partialorder %v284_v32, 0.0004427343  ;;  %v134_v46 = vmax.f32 %v1010_v28, 0.0 }
  0x69   :  { %v292_v47 = vmul.f32 %v1072_v51, %v291_v35  ;;  %vm1150_vm9 = vcmp.lt.f32.partialorder %v293_v5, 0.0004427343  ;;  %v403_v45 = vadd.f32 %v387_v2, %v99_v42  ;;  %v388_v53 = vmul.f32 %v372_v24, %v356_v39  ;;  %v103_v39 = vld [vmem:[#allocation7 + $0x48] sm:$0xff]  ;;  %v376_v42 = vld [vmem:[#allocation10 + $0x50] sm:$0xff] }
  0x6a   :  { %793 = vpow2.f32 %v204_v43  ;;  %v357_v49 = vadd.f32 %v277_v41, %v133_v31  ;;  %v289_v25 = vmul.f32 0.6931472, %v782_v40  ;;  %v286_v56 = vsel %vm1144_vm8, %v283_v34, %v280_v44 }
  0x6b   :  { %417 = vxpose.xlu0.b32.cont [4/16] %v401_v15, 128  ;;  %v784_v17 = vpop.eup %783  ;;  %v300_v28 = vadd.f32 1.0, %v299_v37  ;;  %v308_v51 = vmul.f32 -0.5, %v1134_v29  ;;  %v302_v3 = vand.u32 2147483647, %v1080_v9  ;;  %v135_v60 = vmax.f32 %v1013_v30, 0.0 }
  0x6c   :  { %v1154_v6 = vpop.eup %785  ;;  %v404_v0 = vadd.f32 %v388_v53, %v100_v54  ;;  %v389_v10 = vmul.f32 %v373_v55, %v357_v49  ;;  %v358_v13 = vadd.f32 %v286_v56, %v134_v46  ;;  %v295_v12 = vsel %vm1150_vm9, %v292_v47, %v289_v25  ;;  %v104_v53 = vld [vmem:[#allocation7 + $0x50] sm:$0xff]  ;;  %v377_v49 = vld [vmem:[#allocation10 + $0x58] sm:$0xff] }
  0x6d   :  { %v314_v62 = vadd.f32 1.0, %v1154_v6  ;;  %v298_v48 = vmul.f32 0.6931472, %v784_v17  ;;  %v301_v15 = vmul.f32 %v1080_v9, %v300_v28  ;;  %v309_v16 = vadd.f32 1.0, %v308_v51  ;;  %v102_v9 = vld [vmem:[#allocation7 + $0x40] sm:$0xff] }
  0x6e   :  { %v1160_v63 = vpop.eup %787  ;;  %vm1168_vm10 = vcmp.lt.f32.partialorder %v302_v3, 0.0004427343  ;;  %v311_v30 = vand.u32 2147483647, %v1134_v29  ;;  %v359_v4 = vadd.f32 %v295_v12, %v135_v60  ;;  %v317_v18 = vmul.f32 -0.5, %v1154_v6 }
  0x6f   :  { %418 = vxpose.xlu0.b32.cont [5/16] %v402_v23, 128  ;;  %795 = vlog2.f32 %v314_v62  ;;  %v323_v8 = vadd.f32 1.0, %v1160_v63  ;;  %v405_v20 = vadd.f32 %v389_v10, %v101_v21  ;;  %v390_v19 = vmul.f32 %v374_v14, %v358_v13  ;;  %v378_v10 = vld [vmem:[#allocation10 + $0x60] sm:$0xff] }
  0x70   :  { %v136_v22 = vmax.f32 %v1016_v36, 0.0  ;;  %v304_v61 = vsel %vm1168_vm10, %v301_v15, %v298_v48  ;;  %v310_v31 = vmul.f32 %v1134_v29, %v309_v16  ;;  %v326_v32 = vmul.f32 -0.5, %v1160_v63 }
  0x71   :  { %797 = vlog2.f32 %v323_v8  ;;  %vm1181_vm11 = vcmp.lt.f32.partialorder %v311_v30, 0.0004427343  ;;  %v391_v35 = vmul.f32 %v375_v52, %v359_v4  ;;  %v137_v36 = vmax.f32 %v1021_v50, 0.0  ;;  %v379_v30 = vld [vmem:[#allocation10 + $0x68] sm:$0xff] }
  0x72   :  { %v318_v38 = vadd.f32 1.0, %v317_v18  ;;  %v406_v2 = vadd.f32 %v390_v19, %v102_v9  ;;  %v360_v40 = vadd.f32 %v304_v61, %v136_v22  ;;  %v320_v29 = vand.u32 2147483647, %v1154_v6 }
  0x73   :  { %419 = vxpose.xlu0.b32.cont [6/16] %v403_v45, 128  ;;  %v327_v41 = vadd.f32 1.0, %v326_v32  ;;  %v329_v43 = vand.u32 2147483647, %v1160_v63  ;;  %v407_v26 = vadd.f32 %v391_v35, %v103_v39  ;;  %v138_v50 = vmax.f32 %v1035_v1, 0.0  ;;  %v485_v39 = vld [vmem:[#allocation4 + $0x10] sm:$0xff] }
  0x74   :  { %v1175_v27 = vpop.eup %789  ;;  %v319_v17 = vmul.f32 %v1154_v6, %v318_v38  ;;  %v392_v47 = vmul.f32 %v376_v42, %v360_v40  ;;  %vm321_vm12 = vcmp.lt.f32.partialorder %v320_v29, 0.0004427343  ;;  %v139_v6 = vmax.f32 %v1041_v11, 0.0  ;;  %694 = vmatprep.mubr.f32.mxu1 %v485_v39  ;;  %v483_v40 = vld [vmem:[#allocation4] sm:$0xff]  ;;  %v463_v29 = vld [vmem:[%s1249_s4] sm:$0x1] }
  0x75   :  { %v792_v5 = vpop.eup %791  ;;  %v332_v34 = vadd.f32 1.0, %v1175_v27  ;;  %v335_v45 = vmul.f32 -0.5, %v1175_v27  ;;  %v328_v54 = vmul.f32 %v1160_v63, %v327_v41  ;;  %vm1195_vm13 = vcmp.lt.f32.partialorder %v329_v43, 0.0004427343  ;;  %691 = vmatprep.mubr.f32.mxu0 %v483_v40 }
  0x76   :  { %v307_v37 = vmul.f32 0.6931472, %v792_v5  ;;  %v408_v62 = vadd.f32 %v392_v47, %v104_v53  ;;  %v338_v13 = vand.u32 2147483647, %v1175_v27  ;;  %v140_v4 = vmax.f32 %v1103_v57, 0.0  ;;  %v380_v5 = vld [vmem:[#allocation10 + $0x70] sm:$0xff] }
  0x77   :  { %420 = vxpose.xlu0.b32.cont [7/16] %v404_v0, 128  ;;  %v794_v23 = vpop.eup %793  ;;  %799 = vlog2.f32 %v332_v34  ;;  %v336_v8 = vadd.f32 1.0, %v335_v45  ;;  %v105_v0 = vld [vmem:[#allocation7 + $0x58] sm:$0xff]  ;;  %v465_v42 = vand.u32 2147483647, %v463_v29  ;;  %v464_v53 = vmax.f32 %v463_v29, 0.0 }
  0x78   :  { %v313_v24 = vsel %vm1181_vm11, %v310_v31, %v307_v37  ;;  %v341_v44 = vadd.f32 1.0, %v794_v23  ;;  %v344_v51 = vmul.f32 -0.5, %v794_v23  ;;  %v347_v21 = vand.u32 2147483647, %v794_v23  ;;  %v107_v31 = vld [vmem:[#allocation7 + $0x68] sm:$0xff]  ;;  %v381_v37 = vld [vmem:[#allocation10 + $0x78] sm:$0xff] }
  0x79   :  { %v361_v7 = vadd.f32 %v313_v24, %v137_v36  ;;  %v337_v15 = vmul.f32 %v1175_v27, %v336_v8  ;;  %vm339_vm14 = vcmp.lt.f32.partialorder %v338_v13, 0.0004427343  ;;  %v108_v36 = vld [vmem:[#allocation7 + $0x70] sm:$0xff]  ;;  %v466_v24 = vsub.f32 0.0, %v465_v42 }
  0x7a   :  { %801 = vlog2.f32 %v341_v44  ;;  %v345_v12 = vadd.f32 1.0, %v344_v51  ;;  %vm348_vm15 = vcmp.lt.f32.partialorder %v347_v21, 0.0004427343 }
  0x7b   :  { %421 = vxpose.xlu0.b32.cont [8/16] %v405_v20, 128  ;;  %v393_v3 = vmul.f32 %v377_v49, %v361_v7  ;;  %v141_v20 = vmax.f32 %v1116_v59, 0.0  ;;  %v467_v41 = vmul.f32 1.442695, %v466_v24 }
  0x7c   :  { %v796_v46 = vpop.eup %795  ;;  %v346_v19 = vmul.f32 %v794_v23, %v345_v12  ;;  %v109_v23 = vld [vmem:[#allocation7 + $0x78] sm:$0xff] }
  0x7d   :  { %v316_v25 = vmul.f32 0.6931472, %v796_v46  ;;  %v409_v14 = vadd.f32 %v393_v3, %v105_v0  ;;  %803 = vpow2.f32 %v467_v41 }
  0x7e   :  { %v798_v55 = vpop.eup %797 }
  0x7f   :  { %422 = vxpose.xlu0.b32.cont [9/16] %v406_v2, 128  ;;  %v322_v1 = vsel %vm321_vm12, %v319_v17, %v316_v25  ;;  %v325_v28 = vmul.f32 0.6931472, %v798_v55  ;;  %v479_v55 = vld [vmem:[%s1251_s6] sm:$0x1] }
  0x80   :  { %v362_v60 = vadd.f32 %v322_v1, %v138_v50  ;;  %v462_v1 = vld [vmem:[%s1248_s3] sm:$0x1]  ;;  %s921_s3 = smov [#allocation12]  }
  0x81   :  { %v331_v63 = vsel %vm1195_vm13, %v328_v54, %v325_v28  ;;  %s622_s6 = sshll.u32 %s921_s3, 4  ;;  %s623_s6 = int_to_ptr.vmem [resolvable:$true] %s622_s6 }
  0x82   :  { %v394_v48 = vmul.f32 %v378_v10, %v362_v60  ;;  %v363_v11 = vadd.f32 %v331_v63, %v139_v6  ;;  %s887_s24 = scalar_lea.vmem %s623_s6, 768  ;;  %p892_p7 = scmp.lt.s32.totalorder %s623_s6, %s623_s6 }
  0x83   :  { %423 = vxpose.xlu0.b32.cont [10/16] %v407_v26, 128  ;;  %p888_p6 = scmp.ne.s32.totalorder %s623_s6, %s887_s24  ;;  %p893_p8 = scmp.lt.s32.totalorder %s887_s24, %s887_s24 }
  0x84   :  { %v800_v16 = vpop.eup %799  ;;  %v410_v22 = vadd.f32 %v394_v48, %v106_v58  ;;  %v395_v9 = vmul.f32 %v379_v30, %v363_v11  ;;  %v486_v11 = vld [vmem:[#allocation4 + $0x18] sm:$0xff]  ;;  %v488_v58 = vld [vmem:[#allocation4 + $0x28] sm:$0xff] }
  0x85   :  { %v334_v18 = vmul.f32 0.6931472, %v800_v16  ;;  %v487_v16 = vld [vmem:[#allocation4 + $0x20] sm:$0xff]  ;;  %p894_p9 = por %p893_p8, %p892_p7 }
  0x86   :  { %v411_v34 = vadd.f32 %v395_v9, %v107_v31 }
  0x87   :  { %424 = vxpose.xlu0.b32.cont [11/16] %v408_v62, 128  ;;  %v802_v52 = vpop.eup %801  ;;  %v340_v61 = vsel %vm339_vm14, %v337_v15, %v334_v18  ;;  %v484_v15 = vld [vmem:[#allocation4 + $0x8] sm:$0xff]  ;;  %p895_p10 = pnand %p894_p9, %p888_p6 }
  0x88   :  { %v364_v32 = vadd.f32 %v340_v61, %v140_v4  ;;  %v343_v27 = vmul.f32 0.6931472, %v802_v52 }
  0x8a   :  { %v349_v33 = vsel %vm348_vm15, %v346_v19, %v343_v27  ;;  %v396_v35 = vmul.f32 %v380_v5, %v364_v32  ;;  %v804_v44 = vpop.eup %803 }
  0x8b   :  { %425 = vxpose.xlu0.b32.cont [12/16] %v409_v14, 128  ;;  %v365_v57 = vadd.f32 %v349_v33, %v141_v20  ;;  %v469_v43 = vadd.f32 1.0, %v804_v44  ;;  %v472_v26 = vmul.f32 -0.5, %v804_v44  ;;  %v475_v46 = vand.u32 2147483647, %v804_v44 }
  0x8c   :  { %v412_v59 = vadd.f32 %v396_v35, %v108_v36 }
  0x8d   :  { %v397_v38 = vmul.f32 %v381_v37, %v365_v57  ;;  %805 = vlog2.f32 %v469_v43  ;;  %v473_v17 = vadd.f32 1.0, %v472_v26  ;;  %vm476_vm0 = vcmp.lt.f32.partialorder %v475_v46, 0.0004427343 }
  0x8f   :  { %426 = vxpose.xlu0.b32.cont [13/16] %v410_v22, 128  ;;  %v413_v2 = vadd.f32 %v397_v38, %v109_v23  ;;  %v474_v7 = vmul.f32 %v804_v44, %v473_v17 }
  0x93   :  { %427 = vxpose.xlu0.b32.cont [14/16] %v411_v34, 128 }
  0x97   :  { %428 = vxpose.xlu0.b32.cont [15/16] %v412_v59, 128 }
  0x9a   :  { %v806_v45 = vpop.eup %805 }
  0x9b   :  { %429 = vxpose.xlu0.b32.end [16/16] %v413_v2, 128  ;;  %v471_v49 = vmul.f32 0.6931472, %v806_v45 }
  0x9d   :  { %v477_v54 = vsel %vm476_vm0, %v474_v7, %v471_v49 }
  0x9e   :  { %v478_v56 = vadd.f32 %v477_v54, %v464_v53 }
  0xa0   :  { %v480_v6 = vmul.f32 %v479_v55, %v478_v56 }
  0xa2   :  { %v481_v51 = vadd.f32 %v480_v6, %v462_v1 }
  0xa4   :  { %482 = vst [vmem:[#allocation3] sm:$0x1] %v481_v51 }
  0xab   :  { %v636_v30 = vld [vmem:[#allocation3] ss:$0 sm:$0xff] }
  0xdb   :  { %v1209_v50 = vpop.trf.xlu0 }
  0xdf   :  { %v1211_v47 = vpop.trf.xlu0 }
  0xe3   :  { %v1213_v25 = vpop.trf.xlu0 }
  0xe7   :  { %v1221_v28 = vpop.trf.xlu0 }
  0xeb   :  { %v434_v62 = vpop.trf.xlu0 }
  0xef   :  { %v435_v3 = vpop.trf.xlu0 }
  0xf3   :  { %v436_v60 = vpop.trf.xlu0 }
  0xf7   :  { %v437_v8 = vpop.trf.xlu0 }
  0xfb   :  { %v438_v0 = vpop.trf.xlu0 }
  0xff   :  { %v439_v10 = vpop.trf.xlu0 }
 0x103   :  { %v440_v63 = vpop.trf.xlu0 }
 0x107   :  { %v441_v13 = vpop.trf.xlu0 }
 0x10b   :  { %v442_v12 = vpop.trf.xlu0 }
 0x10f   :  { %v443_v21 = vpop.trf.xlu0 }
 0x113   :  { %v444_v14 = vpop.trf.xlu0 }
 0x117   :  { %v445_v48 = vpop.trf.xlu0 }
 0x118   :  { %659 = vmatprep.subr.mxu0 %v445_v48  ;;  %700 = vmatprep.subr.mxu1 %v445_v48 }
 0x119   :  { %660 = vmatpush3.msra.mxu0 %v445_v48  ;;  %716 = vmatpush3.msra.mxu1 %v445_v48 }
 0x11a   :  { %661 = vmatprep.subr.mxu0 %v444_v14  ;;  %701 = vmatprep.subr.mxu1 %v444_v14 }
 0x11b   :  { %662 = vmatpush3.msra.mxu0 %v444_v14  ;;  %717 = vmatpush3.msra.mxu1 %v444_v14 }
 0x11c   :  { %663 = vmatprep.subr.mxu0 %v443_v21  ;;  %702 = vmatprep.subr.mxu1 %v443_v21 }
 0x11d   :  { %664 = vmatpush3.msra.mxu0 %v443_v21  ;;  %718 = vmatpush3.msra.mxu1 %v443_v21 }
 0x11e   :  { %665 = vmatprep.subr.mxu0 %v442_v12  ;;  %703 = vmatprep.subr.mxu1 %v442_v12 }
 0x11f   :  { %666 = vmatpush3.msra.mxu0 %v442_v12  ;;  %719 = vmatpush3.msra.mxu1 %v442_v12 }
 0x120   :  { %667 = vmatprep.subr.mxu0 %v441_v13  ;;  %704 = vmatprep.subr.mxu1 %v441_v13 }
 0x121   :  { %668 = vmatpush3.msra.mxu0 %v441_v13  ;;  %720 = vmatpush3.msra.mxu1 %v441_v13 }
 0x122   :  { %669 = vmatprep.subr.mxu0 %v440_v63  ;;  %705 = vmatprep.subr.mxu1 %v440_v63 }
 0x123   :  { %670 = vmatpush3.msra.mxu0 %v440_v63  ;;  %721 = vmatpush3.msra.mxu1 %v440_v63 }
 0x124   :  { %671 = vmatprep.subr.mxu0 %v439_v10  ;;  %706 = vmatprep.subr.mxu1 %v439_v10 }
 0x125   :  { %672 = vmatpush3.msra.mxu0 %v439_v10  ;;  %722 = vmatpush3.msra.mxu1 %v439_v10 }
 0x126   :  { %673 = vmatprep.subr.mxu0 %v438_v0  ;;  %707 = vmatprep.subr.mxu1 %v438_v0 }
 0x127   :  { %674 = vmatpush3.msra.mxu0 %v438_v0  ;;  %723 = vmatpush3.msra.mxu1 %v438_v0 }
 0x128   :  { %675 = vmatprep.subr.mxu0 %v437_v8  ;;  %708 = vmatprep.subr.mxu1 %v437_v8 }
 0x129   :  { %676 = vmatpush3.msra.mxu0 %v437_v8  ;;  %724 = vmatpush3.msra.mxu1 %v437_v8 }
 0x12a   :  { %677 = vmatprep.subr.mxu0 %v436_v60  ;;  %709 = vmatprep.subr.mxu1 %v436_v60 }
 0x12b   :  { %678 = vmatpush3.msra.mxu0 %v436_v60  ;;  %725 = vmatpush3.msra.mxu1 %v436_v60 }
 0x12c   :  { %679 = vmatprep.subr.mxu0 %v435_v3  ;;  %710 = vmatprep.subr.mxu1 %v435_v3 }
 0x12d   :  { %680 = vmatpush3.msra.mxu0 %v435_v3  ;;  %726 = vmatpush3.msra.mxu1 %v435_v3 }
 0x12e   :  { %681 = vmatprep.subr.mxu0 %v434_v62  ;;  %711 = vmatprep.subr.mxu1 %v434_v62 }
 0x12f   :  { %682 = vmatpush3.msra.mxu0 %v434_v62  ;;  %727 = vmatpush3.msra.mxu1 %v434_v62 }
 0x130   :  { %683 = vmatprep.subr.mxu0 %v1221_v28  ;;  %712 = vmatprep.subr.mxu1 %v1221_v28 }
 0x131   :  { %684 = vmatpush3.msra.mxu0 %v1221_v28  ;;  %728 = vmatpush3.msra.mxu1 %v1221_v28 }
 0x132   :  { %685 = vmatprep.subr.mxu0 %v1213_v25  ;;  %713 = vmatprep.subr.mxu1 %v1213_v25 }
 0x133   :  { %686 = vmatpush3.msra.mxu0 %v1213_v25  ;;  %729 = vmatpush3.msra.mxu1 %v1213_v25 }
 0x134   :  { %687 = vmatprep.subr.mxu0 %v1211_v47  ;;  %714 = vmatprep.subr.mxu1 %v1211_v47 }
 0x135   :  { %688 = vmatpush3.msra.mxu0 %v1211_v47  ;;  %730 = vmatpush3.msra.mxu1 %v1211_v47 }
 0x136   :  { %689 = vmatprep.subr.mxu0 %v1209_v50  ;;  %715 = vmatprep.subr.mxu1 %v1209_v50 }
 0x137   :  { %690 = vmatpush3.msra.mxu0 %v1209_v50  ;;  %731 = vmatpush3.msra.mxu1 %v1209_v50 }
 0x138   :  { %695 = vmatmul.mubr.f32.vlgmr.msra.gmra.mxu1 %v486_v11  ;;  %692 = vmatmul.mubr.f32.vlgmr.msra.gmra.mxu0 %v484_v15 }
 0x139   :  { %697 = vmatprep.mubr.f32.mxu1 %v487_v16 }
 0x13c   :  { %698 = vmatmul.mubr.f32.gmra.mxu1 %v488_v58 }
 0x1f8   :  { %v696_v4 = vpop.f32.mrf.mxu1  ;;  %v693_v18 = vpop.f32.mrf.mxu0 }
 0x1f9   :  { %v594_v20 = vadd.f32 %v696_v4, %v636_v30  ;;  %v584_v19 = vadd.f32 %v693_v18, %v636_v30 }
 0x1fa   :  { %v588_v52 = vpop.f32.mrf.mxu1  ;;  %v578_v22 = vpop.f32.mrf.mxu0 }
 0x1fb   :  { %610 = vst [vmem:[#allocation12 + $0x18] sm:$0xff] %v594_v20  ;;  %608 = vst [vmem:[#allocation12 + $0x8] sm:$0xff] %v584_v19  ;;  %v589_v9 = vadd.f32 %v636_v30, %v588_v52  ;;  %v579_v61 = vadd.f32 %v636_v30, %v578_v22 }
 0x1fc   :  { %v699_v31 = vpop.f32.mrf.mxu1 }
 0x1fd   :  { %609 = vst [vmem:[#allocation12 + $0x10] sm:$0xff] %v589_v9  ;;  %607 = vst [vmem:[#allocation12] sm:$0xff] %v579_v61  ;;  %v604_v32 = vadd.f32 %v699_v31, %v636_v30 }
 0x1fe   :  { %v598_v5 = vpop.f32.mrf.mxu1 }
 0x1ff   :  { %612 = vst [vmem:[#allocation12 + $0x28] sm:$0xff] %v604_v32  ;;  %v599_v27 = vadd.f32 %v636_v30, %v598_v5 }
 0x201   :  { %611 = vst [vmem:[#allocation12 + $0x20] sm:$0xff] %v599_v27 }
 0x202   :  { %898 = shalt.err (!%p895_p10)
}
 0x203   :  { %628 = dma.vmem_to_hbm [thread:$0]  %s623_s6, 768, %s1252_s7, [#allocation6], %s917_s29, %s917_s29, %s918_s30  }
 0x204   :  { %913 = dma.done.wait [#allocation6], 768  }
 0x205   :  { %914 = vsyncadd [#allocation6], 4294966528 }
 0x206   :  { %632 = vsyncpa [#allocation5], 1 }
 0x207   :  { %633 = vsyncpa [#allocation8], 1 }
 0x208   :  { %634 = vsyncpa [#allocation11], 1 }
 0x209   :  { %635 = vsyncpa [#allocation6], 1 }

// kernel: tpu_custom_call.1
= control target key start
LH: loop header
LB: loop body
LE: loop exit
PB: predicated region body
PF: predicated region fallthrough
CT: control target
= control target key end

     0   :  { %12 = vsyncpa [#allocation5], 0  ;;  %s1245_s0 = inlined_call_operand.hbm [shape: f32[48,128], index: 0, kind: input, shape index: {}]   ;;  %s1246_s1 = inlined_call_operand.hbm [shape: f32[128,128], index: 1, kind: input, shape index: {}]   ;;  %s1247_s2 = inlined_call_operand.hbm [shape: f32[128,128], index: 2, kind: input, shape index: {}]   ;;  %s1248_s3 = inlined_call_operand.vmem [shape: f32[1,128], index: 3, kind: input, shape index: {}]   ;;  %s1249_s4 = inlined_call_operand.vmem [shape: f32[1,128], index: 4, kind: input, shape index: {}]   ;;  %s1250_s5 = inlined_call_operand.hbm [shape: f32[128,128], index: 5, kind: input, shape index: {}]   ;;  %s1251_s6 = inlined_call_operand.vmem [shape: f32[1,128], index: 6, kind: input, shape index: {}]   ;;  %s1252_s7 = inlined_call_operand.hbm [shape: f32[48,128], index: 7, kind: output, shape index: {}]  }
   0x1   :  { %13 = vsyncpa [#allocation8], 0 }
   0x2   :  { %14 = vsyncpa [#allocation11], 0 }
   0x3   :  { %15 = vsyncpa [#allocation6], 0  ;;  %s915_s24 = smov [#allocation7]   ;;  %s916_s26 = smov [#allocation4]  }
   0x4   :  { %s37_s25 = sshll.u32 %s915_s24, 4  ;;  %s25_s27 = sshll.u32 %s916_s26, 4  ;;  %s38_s25 = int_to_ptr.vmem [resolvable:$true] %s37_s25  ;;  %s26_s27 = int_to_ptr.vmem [resolvable:$true] %s25_s27 }
   0x5   :  { %s815_s28 = scalar_lea.vmem %s38_s25, 2048  ;;  %p820_p1 = scmp.lt.s32.totalorder %s38_s25, %s38_s25 }
   0x6   :  { %p816_p0 = scmp.ne.s32.totalorder %s38_s25, %s815_s28  ;;  %p821_p2 = scmp.lt.s32.totalorder %s815_s28, %s815_s28 }
   0x8   :  { %p822_p3 = por %p821_p2, %p820_p1 }
   0xa   :  { %p823_p4 = pnand %p822_p3, %p816_p0 }
   0xc   :  { %826 = shalt.err (!%p823_p4)
}
   0xd   :  { %s917_s29 = smov 128   ;;  %s918_s30 = smov 8  }
   0xe   :  { %43 = dma.hbm_to_vmem [thread:$0]  %s1246_s1, 2048, %s38_s25, [#allocation8], %s917_s29, %s917_s29, %s918_s30  }
   0xf   :  { %s835_s10 = scalar_lea.vmem %s26_s27, 768  ;;  %p840_p6 = scmp.lt.s32.totalorder %s26_s27, %s26_s27 }
  0x10   :  { %p836_p5 = scmp.ne.s32.totalorder %s26_s27, %s835_s10  ;;  %p841_p7 = scmp.lt.s32.totalorder %s835_s10, %s835_s10 }
  0x12   :  { %p842_p8 = por %p841_p7, %p840_p6 }
  0x14   :  { %p843_p9 = pnand %p842_p8, %p836_p5 }
  0x16   :  { %846 = shalt.err (!%p843_p9)
}
  0x17   :  { %31 = dma.hbm_to_vmem [thread:$0]  %s1245_s0, 768, %s26_s27, [#allocation5], %s917_s29, %s917_s29, %s918_s30  }
  0x18   :  { %s919_s13 = smov [#allocation9]   ;;  %s920_s15 = smov [#allocation10]  }
  0x19   :  { %s49_s14 = sshll.u32 %s919_s13, 4  ;;  %s65_s16 = sshll.u32 %s920_s15, 4  ;;  %s50_s14 = int_to_ptr.vmem [resolvable:$true] %s49_s14  ;;  %s66_s16 = int_to_ptr.vmem [resolvable:$true] %s65_s16 }
  0x1a   :  { %s855_s1 = scalar_lea.vmem %s50_s14, 2048  ;;  %p860_p11 = scmp.lt.s32.totalorder %s50_s14, %s50_s14 }
  0x1b   :  { %p856_p10 = scmp.ne.s32.totalorder %s50_s14, %s855_s1  ;;  %p861_p12 = scmp.lt.s32.totalorder %s855_s1, %s855_s1 }
  0x1d   :  { %p862_p13 = por %p861_p12, %p860_p11 }
  0x1f   :  { %p863_p0 = pnand %p862_p13, %p856_p10 }
  0x21   :  { %866 = shalt.err (!%p863_p0)
}
  0x22   :  { %55 = dma.hbm_to_vmem [thread:$0]  %s1247_s2, 2048, %s50_s14, [#allocation8], %s917_s29, %s917_s29, %s918_s30  }
  0x23   :  { %s875_s0 = scalar_lea.vmem %s66_s16, 2048  ;;  %p880_p2 = scmp.lt.s32.totalorder %s66_s16, %s66_s16 }
  0x24   :  { %p876_p1 = scmp.ne.s32.totalorder %s66_s16, %s875_s0  ;;  %p881_p3 = scmp.lt.s32.totalorder %s875_s0, %s875_s0 }
  0x26   :  { %p882_p4 = por %p881_p3, %p880_p2 }
  0x28   :  { %p883_p5 = pnand %p882_p4, %p876_p1 }
  0x2a   :  { %886 = shalt.err (!%p883_p5)
}
  0x2b   :  { %71 = dma.hbm_to_vmem [thread:$0]  %s1250_s5, 2048, %s66_s16, [#allocation11], %s917_s29, %s917_s29, %s918_s30  }
  0x2c   :  { %907 = dma.done.wait [#allocation5], 768  }
  0x2d   :  { %908 = vsyncadd [#allocation5], 4294966528 }
  0x2e   :  { %909 = dma.done.wait [#allocation8], 4096  }
  0x2f   :  { %910 = vsyncadd [#allocation8], 4294963200 }
  0x30   :  { %911 = dma.done.wait [#allocation11], 2048  }
  0x31   :  { %912 = vsyncadd [#allocation11], 4294965248  ;;  %v986_v0 = vld [vmem:[#allocation9] sm:$0xff]  ;;  %v989_v2 = vld [vmem:[#allocation9 + $0x8] sm:$0xff] }
  0x32   :  { %v142_v1 = vand.u32 2147483647, %v986_v0  ;;  %v143_v3 = vand.u32 2147483647, %v989_v2  ;;  %v992_v4 = vld [vmem:[#allocation9 + $0x10] sm:$0xff]  ;;  %v995_v7 = vld [vmem:[#allocation9 + $0x18] sm:$0xff] }
  0x33   :  { %v144_v6 = vand.u32 2147483647, %v992_v4  ;;  %v145_v9 = vand.u32 2147483647, %v995_v7  ;;  %v998_v12 = vld [vmem:[#allocation9 + $0x20] sm:$0xff]  ;;  %v1001_v17 = vld [vmem:[#allocation9 + $0x28] sm:$0xff] }
  0x34   :  { %v158_v5 = vsub.f32 0.0, %v142_v1  ;;  %v159_v8 = vsub.f32 0.0, %v143_v3  ;;  %v146_v15 = vand.u32 2147483647, %v998_v12  ;;  %v1003_v20 = vld [vmem:[#allocation9 + $0x30] sm:$0xff]  ;;  %v1007_v24 = vld [vmem:[#allocation9 + $0x38] sm:$0xff] }
  0x35   :  { %v160_v11 = vsub.f32 0.0, %v144_v6  ;;  %v161_v14 = vsub.f32 0.0, %v145_v9  ;;  %v147_v21 = vand.u32 2147483647, %v1001_v17  ;;  %v148_v22 = vand.u32 2147483647, %v1003_v20 }
  0x36   :  { %v174_v10 = vmul.f32 1.442695, %v158_v5  ;;  %v176_v13 = vmul.f32 1.442695, %v159_v8  ;;  %v162_v19 = vsub.f32 0.0, %v146_v15  ;;  %v1010_v28 = vld [vmem:[#allocation9 + $0x40] sm:$0xff] }
  0x37   :  { %v178_v16 = vmul.f32 1.442695, %v160_v11  ;;  %v180_v18 = vmul.f32 1.442695, %v161_v14  ;;  %v163_v25 = vsub.f32 0.0, %v147_v21  ;;  %v164_v26 = vsub.f32 0.0, %v148_v22 }
  0x38   :  { %739 = vpow2.f32 %v174_v10  ;;  %v182_v23 = vmul.f32 1.442695, %v162_v19  ;;  %v149_v27 = vand.u32 2147483647, %v1007_v24  ;;  %v150_v29 = vand.u32 2147483647, %v1010_v28 }
  0x39   :  { %741 = vpow2.f32 %v176_v13  ;;  %v1013_v30 = vld [vmem:[#allocation9 + $0x48] sm:$0xff]  ;;  %v184_v31 = vmul.f32 1.442695, %v163_v25  ;;  %v186_v32 = vmul.f32 1.442695, %v164_v26  ;;  %v1016_v36 = vld [vmem:[#allocation9 + $0x50] sm:$0xff] }
  0x3a   :  { %743 = vpow2.f32 %v178_v16  ;;  %v165_v33 = vsub.f32 0.0, %v149_v27  ;;  %v166_v34 = vsub.f32 0.0, %v150_v29  ;;  %v151_v35 = vand.u32 2147483647, %v1013_v30  ;;  %v1021_v50 = vld [vmem:[#allocation9 + $0x58] sm:$0xff]  ;;  %v1035_v1 = vld [vmem:[#allocation9 + $0x60] sm:$0xff] }
  0x3b   :  { %745 = vpow2.f32 %v180_v18  ;;  %v152_v38 = vand.u32 2147483647, %v1016_v36  ;;  %v153_v54 = vand.u32 2147483647, %v1021_v50  ;;  %v126_v58 = vmax.f32 %v986_v0, 0.0  ;;  %v1041_v11 = vld [vmem:[#allocation9 + $0x68] sm:$0xff] }
  0x3c   :  { %747 = vpow2.f32 %v182_v23  ;;  %v188_v37 = vmul.f32 1.442695, %v165_v33  ;;  %v190_v39 = vmul.f32 1.442695, %v166_v34  ;;  %v167_v40 = vsub.f32 0.0, %v151_v35 }
  0x3d   :  { %749 = vpow2.f32 %v184_v31  ;;  %v168_v42 = vsub.f32 0.0, %v152_v38  ;;  %v127_v61 = vmax.f32 %v989_v2, 0.0  ;;  %v128_v5 = vmax.f32 %v992_v4, 0.0 }
  0x3e   :  { %751 = vpow2.f32 %v186_v32  ;;  %v192_v47 = vmul.f32 1.442695, %v167_v40  ;;  %v129_v6 = vmax.f32 %v995_v7, 0.0  ;;  %v169_v8 = vsub.f32 0.0, %v153_v54 }
  0x3f   :  { %753 = vpow2.f32 %v188_v37  ;;  %v194_v51 = vmul.f32 1.442695, %v168_v42  ;;  %v154_v16 = vand.u32 2147483647, %v1035_v1  ;;  %v130_v21 = vmax.f32 %v998_v12, 0.0  ;;  %v369_v42 = vld [vmem:[#allocation10 + $0x18] sm:$0xff] }
  0x40   :  { %755 = vpow2.f32 %v190_v39  ;;  %v196_v23 = vmul.f32 1.442695, %v169_v8  ;;  %v155_v25 = vand.u32 2147483647, %v1041_v11 }
  0x45   :  { %v740_v41 = vpop.eup %739 }
  0x46   :  { %v742_v43 = vpop.eup %741  ;;  %v206_v44 = vadd.f32 1.0, %v740_v41  ;;  %v209_v55 = vmul.f32 -0.5, %v740_v41  ;;  %v212_v3 = vand.u32 2147483647, %v740_v41 }
  0x47   :  { %v744_v45 = vpop.eup %743  ;;  %v215_v46 = vadd.f32 1.0, %v742_v43  ;;  %v218_v59 = vmul.f32 -0.5, %v742_v43  ;;  %v221_v14 = vand.u32 2147483647, %v742_v43 }
  0x48   :  { %v1019_v48 = vpop.eup %745  ;;  %757 = vlog2.f32 %v206_v44  ;;  %v224_v49 = vadd.f32 1.0, %v744_v45  ;;  %v227_v62 = vmul.f32 -0.5, %v744_v45  ;;  %v210_v9 = vadd.f32 1.0, %v209_v55 }
  0x49   :  { %759 = vlog2.f32 %v215_v46  ;;  %v1023_v52 = vpop.eup %747  ;;  %v233_v53 = vadd.f32 1.0, %v1019_v48  ;;  %v236_v0 = vmul.f32 -0.5, %v1019_v48  ;;  %v219_v13 = vadd.f32 1.0, %v218_v59 }
  0x4a   :  { %761 = vlog2.f32 %v224_v49  ;;  %v242_v56 = vadd.f32 1.0, %v1023_v52  ;;  %v1028_v57 = vpop.eup %749  ;;  %v245_v15 = vmul.f32 -0.5, %v1023_v52  ;;  %v228_v4 = vadd.f32 1.0, %v227_v62 }
  0x4b   :  { %763 = vpow2.f32 %v192_v47  ;;  %v1031_v60 = vpop.eup %751  ;;  %v251_v63 = vadd.f32 1.0, %v1028_v57  ;;  %v230_v18 = vand.u32 2147483647, %v744_v45  ;;  %v239_v19 = vand.u32 2147483647, %v1019_v48 }
  0x4c   :  { %765 = vlog2.f32 %v233_v53  ;;  %v260_v10 = vadd.f32 1.0, %v1031_v60  ;;  %v1043_v2 = vpop.eup %753  ;;  %vm1049_vm0 = vcmp.lt.f32.partialorder %v212_v3, 0.0004427343  ;;  %v211_v27 = vmul.f32 %v740_v41, %v210_v9  ;;  %v366_v53 = vld [vmem:[#allocation10] sm:$0xff] }
  0x4d   :  { %767 = vpow2.f32 %v194_v51  ;;  %v1054_v26 = vpop.eup %755  ;;  %v237_v29 = vadd.f32 1.0, %v236_v0  ;;  %v269_v31 = vadd.f32 1.0, %v1043_v2  ;;  %v220_v33 = vmul.f32 %v742_v43, %v219_v13  ;;  %v94_v0 = vld [vmem:[#allocation7] sm:$0xff] }
  0x4e   :  { %769 = vlog2.f32 %v242_v56  ;;  %vm1057_vm1 = vcmp.lt.f32.partialorder %v221_v14, 0.0004427343  ;;  %v246_v35 = vadd.f32 1.0, %v245_v15  ;;  %v254_v37 = vmul.f32 -0.5, %v1028_v57 }
  0x4f   :  { %771 = vlog2.f32 %v251_v63  ;;  %v229_v40 = vmul.f32 %v744_v45, %v228_v4  ;;  %vm1062_vm2 = vcmp.lt.f32.partialorder %v230_v18, 0.0004427343  ;;  %vm1066_vm3 = vcmp.lt.f32.partialorder %v239_v19, 0.0004427343  ;;  %v367_v63 = vld [vmem:[#allocation10 + $0x8] sm:$0xff] }
  0x50   :  { %773 = vlog2.f32 %v260_v10  ;;  %v248_v46 = vand.u32 2147483647, %v1023_v52  ;;  %v278_v47 = vadd.f32 1.0, %v1054_v26  ;;  %v170_v49 = vsub.f32 0.0, %v154_v16  ;;  %v95_v18 = vld [vmem:[#allocation7 + $0x8] sm:$0xff] }
  0x51   :  { %v238_v55 = vmul.f32 %v1019_v48, %v237_v29  ;;  %775 = vlog2.f32 %v269_v31  ;;  %v247_v3 = vmul.f32 %v1023_v52, %v246_v35  ;;  %v255_v8 = vadd.f32 1.0, %v254_v37  ;;  %v368_v52 = vld [vmem:[#allocation10 + $0x10] sm:$0xff] }
  0x52   :  { %v263_v48 = vmul.f32 -0.5, %v1031_v60  ;;  %777 = vlog2.f32 %v278_v47  ;;  %vm1088_vm4 = vcmp.lt.f32.partialorder %v248_v46, 0.0004427343  ;;  %v272_v37 = vmul.f32 -0.5, %v1043_v2 }
  0x53   :  { %779 = vpow2.f32 %v196_v23  ;;  %v256_v34 = vmul.f32 %v1028_v57, %v255_v8  ;;  %v96_v23 = vld [vmem:[#allocation7 + $0x10] sm:$0xff]  ;;  %v266_v7 = vand.u32 2147483647, %v1031_v60  ;;  %v133_v31 = vmax.f32 %v1007_v24, 0.0 }
  0x54   :  { %v264_v35 = vadd.f32 1.0, %v263_v48  ;;  %v273_v8 = vadd.f32 1.0, %v272_v37  ;;  %v372_v24 = vld [vmem:[#allocation10 + $0x30] sm:$0xff] }
  0x55   :  { %v758_v32 = vpop.eup %757  ;;  %vm1121_vm6 = vcmp.lt.f32.partialorder %v266_v7, 0.0004427343 }
  0x56   :  { %v760_v38 = vpop.eup %759  ;;  %v208_v39 = vmul.f32 0.6931472, %v758_v32  ;;  %v257_v32 = vand.u32 2147483647, %v1028_v57  ;;  %v1103_v57 = vld [vmem:[#allocation9 + $0x70] sm:$0xff] }
  0x57   :  { %v762_v44 = vpop.eup %761  ;;  %v217_v43 = vmul.f32 0.6931472, %v760_v38 }
  0x58   :  { %v1072_v51 = vpop.eup %763  ;;  %v214_v45 = vsel %vm1049_vm0, %v211_v27, %v208_v39  ;;  %v226_v54 = vmul.f32 0.6931472, %v762_v44  ;;  %vm1105_vm5 = vcmp.lt.f32.partialorder %v257_v32, 0.0004427343  ;;  %v284_v32 = vand.u32 2147483647, %v1054_v26 }
  0x59   :  { %v766_v56 = vpop.eup %765  ;;  %v350_v59 = vadd.f32 %v214_v45, %v126_v58  ;;  %v223_v62 = vsel %vm1057_vm1, %v220_v33, %v217_v43  ;;  %v287_v4 = vadd.f32 1.0, %v1072_v51  ;;  %v131_v33 = vmax.f32 %v1001_v17, 0.0 }
  0x5a   :  { %v1080_v9 = vpop.eup %767  ;;  %v351_v10 = vadd.f32 %v223_v62, %v127_v61  ;;  %v232_v13 = vsel %vm1062_vm2, %v229_v40, %v226_v54  ;;  %v235_v14 = vmul.f32 0.6931472, %v766_v56  ;;  %v198_v43 = vmul.f32 1.442695, %v170_v49  ;;  %v97_v62 = vld [vmem:[#allocation7 + $0x18] sm:$0xff] }
  0x5b   :  { %v770_v15 = vpop.eup %769  ;;  %v382_v16 = vmul.f32 %v366_v53, %v350_v59  ;;  %v352_v58 = vadd.f32 %v232_v13, %v128_v5  ;;  %v296_v5 = vadd.f32 1.0, %v1080_v9  ;;  %781 = vlog2.f32 %v287_v4  ;;  %v1116_v59 = vld [vmem:[#allocation9 + $0x78] sm:$0xff] }
  0x5c   :  { %v383_v19 = vmul.f32 %v367_v63, %v351_v10  ;;  %v241_v22 = vsel %vm1066_vm3, %v238_v55, %v235_v14  ;;  %v244_v27 = vmul.f32 0.6931472, %v770_v15  ;;  %v772_v61 = vpop.eup %771  ;;  %v171_v17 = vsub.f32 0.0, %v155_v25  ;;  %v370_v63 = vld [vmem:[#allocation10 + $0x20] sm:$0xff] }
  0x5d   :  { %v398_v29 = vadd.f32 %v382_v16, %v94_v0  ;;  %v384_v39 = vmul.f32 %v368_v52, %v352_v58  ;;  %v353_v40 = vadd.f32 %v241_v22, %v129_v6  ;;  %v253_v44 = vmul.f32 0.6931472, %v772_v61  ;;  %v774_v46 = vpop.eup %773 }
  0x5e   :  { %v399_v38 = vadd.f32 %v383_v19, %v95_v18  ;;  %v250_v41 = vsel %vm1088_vm4, %v247_v3, %v244_v27  ;;  %v275_v6 = vand.u32 2147483647, %v1043_v2  ;;  %783 = vlog2.f32 %v296_v5  ;;  %v776_v0 = vpop.eup %775  ;;  %v371_v19 = vld [vmem:[#allocation10 + $0x28] sm:$0xff] }
  0x5f   :  { %414 = vxpose.xlu0.b32.start [1/16] %v398_v29, 128  ;;  %v265_v45 = vmul.f32 %v1031_v60, %v264_v35  ;;  %v281_v53 = vmul.f32 -0.5, %v1054_v26  ;;  %785 = vpow2.f32 %v198_v43  ;;  %v200_v49 = vmul.f32 1.442695, %v171_v17  ;;  %v778_v18 = vpop.eup %777 }
  0x60   :  { %v400_v25 = vadd.f32 %v384_v39, %v96_v23  ;;  %v385_v54 = vmul.f32 %v369_v42, %v353_v40  ;;  %v354_v55 = vadd.f32 %v250_v41, %v130_v21  ;;  %v156_v56 = vand.u32 2147483647, %v1103_v57  ;;  %v1134_v29 = vpop.eup %779  ;;  %v99_v42 = vld [vmem:[#allocation7 + $0x28] sm:$0xff] }
  0x61   :  { %v259_v3 = vsel %vm1105_vm5, %v256_v34, %v253_v44  ;;  %v262_v60 = vmul.f32 0.6931472, %v774_v46  ;;  %787 = vpow2.f32 %v200_v49  ;;  %v132_v10 = vmax.f32 %v1003_v20, 0.0  ;;  %v98_v20 = vld [vmem:[#allocation7 + $0x20] sm:$0xff] }
  0x62   :  { %v282_v12 = vadd.f32 1.0, %v281_v53  ;;  %v290_v21 = vmul.f32 -0.5, %v1072_v51  ;;  %v172_v14 = vsub.f32 0.0, %v156_v56  ;;  %v157_v48 = vand.u32 2147483647, %v1116_v59 }
  0x63   :  { %415 = vxpose.xlu0.b32.cont [2/16] %v399_v38, 128  ;;  %v401_v15 = vadd.f32 %v385_v54, %v97_v62  ;;  %v386_v16 = vmul.f32 %v370_v63, %v354_v55  ;;  %v355_v58 = vadd.f32 %v259_v3, %v131_v33  ;;  %vm1127_vm7 = vcmp.lt.f32.partialorder %v275_v6, 0.0004427343  ;;  %v100_v54 = vld [vmem:[#allocation7 + $0x30] sm:$0xff]  ;;  %v373_v55 = vld [vmem:[#allocation10 + $0x38] sm:$0xff] }
  0x64   :  { %v268_v52 = vsel %vm1121_vm6, %v265_v45, %v262_v60  ;;  %v271_v22 = vmul.f32 0.6931472, %v776_v0  ;;  %v274_v27 = vmul.f32 %v1043_v2, %v273_v8  ;;  %v202_v61 = vmul.f32 1.442695, %v172_v14  ;;  %v374_v14 = vld [vmem:[#allocation10 + $0x40] sm:$0xff] }
  0x65   :  { %v293_v5 = vand.u32 2147483647, %v1072_v51  ;;  %v173_v33 = vsub.f32 0.0, %v157_v48  ;;  %v283_v34 = vmul.f32 %v1054_v26, %v282_v12  ;;  %v291_v35 = vadd.f32 1.0, %v290_v21  ;;  %v101_v21 = vld [vmem:[#allocation7 + $0x38] sm:$0xff] }
  0x66   :  { %v299_v37 = vmul.f32 -0.5, %v1080_v9  ;;  %v305_v38 = vadd.f32 1.0, %v1134_v29  ;;  %v402_v23 = vadd.f32 %v386_v16, %v98_v20  ;;  %v387_v2 = vmul.f32 %v371_v19, %v355_v58  ;;  %v106_v58 = vld [vmem:[#allocation7 + $0x60] sm:$0xff] }
  0x67   :  { %416 = vxpose.xlu0.b32.cont [3/16] %v400_v25, 128  ;;  %v356_v39 = vadd.f32 %v268_v52, %v132_v10  ;;  %789 = vpow2.f32 %v202_v61  ;;  %v277_v41 = vsel %vm1127_vm7, %v274_v27, %v271_v22  ;;  %v280_v44 = vmul.f32 0.6931472, %v778_v18  ;;  %v375_v52 = vld [vmem:[#allocation10 + $0x48] sm:$0xff] }
  0x68   :  { %v782_v40 = vpop.eup %781  ;;  %791 = vlog2.f32 %v305_v38  ;;  %v204_v43 = vmul.f32 1.442695, %v173_v33  ;;  %vm1144_vm8 = vcmp.lt.f32.partialorder %v284_v32, 0.0004427343  ;;  %v134_v46 = vmax.f32 %v1010_v28, 0.0 }
  0x69   :  { %v292_v47 = vmul.f32 %v1072_v51, %v291_v35  ;;  %vm1150_vm9 = vcmp.lt.f32.partialorder %v293_v5, 0.0004427343  ;;  %v403_v45 = vadd.f32 %v387_v2, %v99_v42  ;;  %v388_v53 = vmul.f32 %v372_v24, %v356_v39  ;;  %v103_v39 = vld [vmem:[#allocation7 + $0x48] sm:$0xff]  ;;  %v376_v42 = vld [vmem:[#allocation10 + $0x50] sm:$0xff] }
  0x6a   :  { %793 = vpow2.f32 %v204_v43  ;;  %v357_v49 = vadd.f32 %v277_v41, %v133_v31  ;;  %v289_v25 = vmul.f32 0.6931472, %v782_v40  ;;  %v286_v56 = vsel %vm1144_vm8, %v283_v34, %v280_v44 }
  0x6b   :  { %417 = vxpose.xlu0.b32.cont [4/16] %v401_v15, 128  ;;  %v784_v17 = vpop.eup %783  ;;  %v300_v28 = vadd.f32 1.0, %v299_v37  ;;  %v308_v51 = vmul.f32 -0.5, %v1134_v29  ;;  %v302_v3 = vand.u32 2147483647, %v1080_v9  ;;  %v135_v60 = vmax.f32 %v1013_v30, 0.0 }
  0x6c   :  { %v1154_v6 = vpop.eup %785  ;;  %v404_v0 = vadd.f32 %v388_v53, %v100_v54  ;;  %v389_v10 = vmul.f32 %v373_v55, %v357_v49  ;;  %v358_v13 = vadd.f32 %v286_v56, %v134_v46  ;;  %v295_v12 = vsel %vm1150_vm9, %v292_v47, %v289_v25  ;;  %v104_v53 = vld [vmem:[#allocation7 + $0x50] sm:$0xff]  ;;  %v377_v49 = vld [vmem:[#allocation10 + $0x58] sm:$0xff] }
  0x6d   :  { %v314_v62 = vadd.f32 1.0, %v1154_v6  ;;  %v298_v48 = vmul.f32 0.6931472, %v784_v17  ;;  %v301_v15 = vmul.f32 %v1080_v9, %v300_v28  ;;  %v309_v16 = vadd.f32 1.0, %v308_v51  ;;  %v102_v9 = vld [vmem:[#allocation7 + $0x40] sm:$0xff] }
  0x6e   :  { %v1160_v63 = vpop.eup %787  ;;  %vm1168_vm10 = vcmp.lt.f32.partialorder %v302_v3, 0.0004427343  ;;  %v311_v30 = vand.u32 2147483647, %v1134_v29  ;;  %v359_v4 = vadd.f32 %v295_v12, %v135_v60  ;;  %v317_v18 = vmul.f32 -0.5, %v1154_v6 }
  0x6f   :  { %418 = vxpose.xlu0.b32.cont [5/16] %v402_v23, 128  ;;  %795 = vlog2.f32 %v314_v62  ;;  %v323_v8 = vadd.f32 1.0, %v1160_v63  ;;  %v405_v20 = vadd.f32 %v389_v10, %v101_v21  ;;  %v390_v19 = vmul.f32 %v374_v14, %v358_v13  ;;  %v378_v10 = vld [vmem:[#allocation10 + $0x60] sm:$0xff] }
  0x70   :  { %v136_v22 = vmax.f32 %v1016_v36, 0.0  ;;  %v304_v61 = vsel %vm1168_vm10, %v301_v15, %v298_v48  ;;  %v310_v31 = vmul.f32 %v1134_v29, %v309_v16  ;;  %v326_v32 = vmul.f32 -0.5, %v1160_v63 }
  0x71   :  { %797 = vlog2.f32 %v323_v8  ;;  %vm1181_vm11 = vcmp.lt.f32.partialorder %v311_v30, 0.0004427343  ;;  %v391_v35 = vmul.f32 %v375_v52, %v359_v4  ;;  %v137_v36 = vmax.f32 %v1021_v50, 0.0  ;;  %v379_v30 = vld [vmem:[#allocation10 + $0x68] sm:$0xff] }
  0x72   :  { %v318_v38 = vadd.f32 1.0, %v317_v18  ;;  %v406_v2 = vadd.f32 %v390_v19, %v102_v9  ;;  %v360_v40 = vadd.f32 %v304_v61, %v136_v22  ;;  %v320_v29 = vand.u32 2147483647, %v1154_v6 }
  0x73   :  { %419 = vxpose.xlu0.b32.cont [6/16] %v403_v45, 128  ;;  %v327_v41 = vadd.f32 1.0, %v326_v32  ;;  %v329_v43 = vand.u32 2147483647, %v1160_v63  ;;  %v407_v26 = vadd.f32 %v391_v35, %v103_v39  ;;  %v138_v50 = vmax.f32 %v1035_v1, 0.0  ;;  %v485_v39 = vld [vmem:[#allocation4 + $0x10] sm:$0xff] }
  0x74   :  { %v1175_v27 = vpop.eup %789  ;;  %v319_v17 = vmul.f32 %v1154_v6, %v318_v38  ;;  %v392_v47 = vmul.f32 %v376_v42, %v360_v40  ;;  %vm321_vm12 = vcmp.lt.f32.partialorder %v320_v29, 0.0004427343  ;;  %v139_v6 = vmax.f32 %v1041_v11, 0.0  ;;  %694 = vmatprep.mubr.f32.mxu1 %v485_v39  ;;  %v483_v40 = vld [vmem:[#allocation4] sm:$0xff]  ;;  %v463_v29 = vld [vmem:[%s1249_s4] sm:$0x1] }
  0x75   :  { %v792_v5 = vpop.eup %791  ;;  %v332_v34 = vadd.f32 1.0, %v1175_v27  ;;  %v335_v45 = vmul.f32 -0.5, %v1175_v27  ;;  %v328_v54 = vmul.f32 %v1160_v63, %v327_v41  ;;  %vm1195_vm13 = vcmp.lt.f32.partialorder %v329_v43, 0.0004427343  ;;  %691 = vmatprep.mubr.f32.mxu0 %v483_v40 }
  0x76   :  { %v307_v37 = vmul.f32 0.6931472, %v792_v5  ;;  %v408_v62 = vadd.f32 %v392_v47, %v104_v53  ;;  %v338_v13 = vand.u32 2147483647, %v1175_v27  ;;  %v140_v4 = vmax.f32 %v1103_v57, 0.0  ;;  %v380_v5 = vld [vmem:[#allocation10 + $0x70] sm:$0xff] }
  0x77   :  { %420 = vxpose.xlu0.b32.cont [7/16] %v404_v0, 128  ;;  %v794_v23 = vpop.eup %793  ;;  %799 = vlog2.f32 %v332_v34  ;;  %v336_v8 = vadd.f32 1.0, %v335_v45  ;;  %v105_v0 = vld [vmem:[#allocation7 + $0x58] sm:$0xff]  ;;  %v465_v42 = vand.u32 2147483647, %v463_v29  ;;  %v464_v53 = vmax.f32 %v463_v29, 0.0 }
  0x78   :  { %v313_v24 = vsel %vm1181_vm11, %v310_v31, %v307_v37  ;;  %v341_v44 = vadd.f32 1.0, %v794_v23  ;;  %v344_v51 = vmul.f32 -0.5, %v794_v23  ;;  %v347_v21 = vand.u32 2147483647, %v794_v23  ;;  %v107_v31 = vld [vmem:[#allocation7 + $0x68] sm:$0xff]  ;;  %v381_v37 = vld [vmem:[#allocation10 + $0x78] sm:$0xff] }
  0x79   :  { %v361_v7 = vadd.f32 %v313_v24, %v137_v36  ;;  %v337_v15 = vmul.f32 %v1175_v27, %v336_v8  ;;  %vm339_vm14 = vcmp.lt.f32.partialorder %v338_v13, 0.0004427343  ;;  %v108_v36 = vld [vmem:[#allocation7 + $0x70] sm:$0xff]  ;;  %v466_v24 = vsub.f32 0.0, %v465_v42 }
  0x7a   :  { %801 = vlog2.f32 %v341_v44  ;;  %v345_v12 = vadd.f32 1.0, %v344_v51  ;;  %vm348_vm15 = vcmp.lt.f32.partialorder %v347_v21, 0.0004427343 }
  0x7b   :  { %421 = vxpose.xlu0.b32.cont [8/16] %v405_v20, 128  ;;  %v393_v3 = vmul.f32 %v377_v49, %v361_v7  ;;  %v141_v20 = vmax.f32 %v1116_v59, 0.0  ;;  %v467_v41 = vmul.f32 1.442695, %v466_v24 }
  0x7c   :  { %v796_v46 = vpop.eup %795  ;;  %v346_v19 = vmul.f32 %v794_v23, %v345_v12  ;;  %v109_v23 = vld [vmem:[#allocation7 + $0x78] sm:$0xff] }
  0x7d   :  { %v316_v25 = vmul.f32 0.6931472, %v796_v46  ;;  %v409_v14 = vadd.f32 %v393_v3, %v105_v0  ;;  %803 = vpow2.f32 %v467_v41 }
  0x7e   :  { %v798_v55 = vpop.eup %797 }
  0x7f   :  { %422 = vxpose.xlu0.b32.cont [9/16] %v406_v2, 128  ;;  %v322_v1 = vsel %vm321_vm12, %v319_v17, %v316_v25  ;;  %v325_v28 = vmul.f32 0.6931472, %v798_v55  ;;  %v479_v55 = vld [vmem:[%s1251_s6] sm:$0x1] }
  0x80   :  { %v362_v60 = vadd.f32 %v322_v1, %v138_v50  ;;  %v462_v1 = vld [vmem:[%s1248_s3] sm:$0x1]  ;;  %s921_s3 = smov [#allocation12]  }
  0x81   :  { %v331_v63 = vsel %vm1195_vm13, %v328_v54, %v325_v28  ;;  %s622_s6 = sshll.u32 %s921_s3, 4  ;;  %s623_s6 = int_to_ptr.vmem [resolvable:$true] %s622_s6 }
  0x82   :  { %v394_v48 = vmul.f32 %v378_v10, %v362_v60  ;;  %v363_v11 = vadd.f32 %v331_v63, %v139_v6  ;;  %s887_s24 = scalar_lea.vmem %s623_s6, 768  ;;  %p892_p7 = scmp.lt.s32.totalorder %s623_s6, %s623_s6 }
  0x83   :  { %423 = vxpose.xlu0.b32.cont [10/16] %v407_v26, 128  ;;  %p888_p6 = scmp.ne.s32.totalorder %s623_s6, %s887_s24  ;;  %p893_p8 = scmp.lt.s32.totalorder %s887_s24, %s887_s24 }
  0x84   :  { %v800_v16 = vpop.eup %799  ;;  %v410_v22 = vadd.f32 %v394_v48, %v106_v58  ;;  %v395_v9 = vmul.f32 %v379_v30, %v363_v11  ;;  %v486_v11 = vld [vmem:[#allocation4 + $0x18] sm:$0xff]  ;;  %v488_v58 = vld [vmem:[#allocation4 + $0x28] sm:$0xff] }
  0x85   :  { %v334_v18 = vmul.f32 0.6931472, %v800_v16  ;;  %v487_v16 = vld [vmem:[#allocation4 + $0x20] sm:$0xff]  ;;  %p894_p9 = por %p893_p8, %p892_p7 }
  0x86   :  { %v411_v34 = vadd.f32 %v395_v9, %v107_v31 }
  0x87   :  { %424 = vxpose.xlu0.b32.cont [11/16] %v408_v62, 128  ;;  %v802_v52 = vpop.eup %801  ;;  %v340_v61 = vsel %vm339_vm14, %v337_v15, %v334_v18  ;;  %v484_v15 = vld [vmem:[#allocation4 + $0x8] sm:$0xff]  ;;  %p895_p10 = pnand %p894_p9, %p888_p6 }
  0x88   :  { %v364_v32 = vadd.f32 %v340_v61, %v140_v4  ;;  %v343_v27 = vmul.f32 0.6931472, %v802_v52 }
  0x8a   :  { %v349_v33 = vsel %vm348_vm15, %v346_v19, %v343_v27  ;;  %v396_v35 = vmul.f32 %v380_v5, %v364_v32  ;;  %v804_v44 = vpop.eup %803 }
  0x8b   :  { %425 = vxpose.xlu0.b32.cont [12/16] %v409_v14, 128  ;;  %v365_v57 = vadd.f32 %v349_v33, %v141_v20  ;;  %v469_v43 = vadd.f32 1.0, %v804_v44  ;;  %v472_v26 = vmul.f32 -0.5, %v804_v44  ;;  %v475_v46 = vand.u32 2147483647, %v804_v44 }
  0x8c   :  { %v412_v59 = vadd.f32 %v396_v35, %v108_v36 }
  0x8d   :  { %v397_v38 = vmul.f32 %v381_v37, %v365_v57  ;;  %805 = vlog2.f32 %v469_v43  ;;  %v473_v17 = vadd.f32 1.0, %v472_v26  ;;  %vm476_vm0 = vcmp.lt.f32.partialorder %v475_v46, 0.0004427343 }
  0x8f   :  { %426 = vxpose.xlu0.b32.cont [13/16] %v410_v22, 128  ;;  %v413_v2 = vadd.f32 %v397_v38, %v109_v23  ;;  %v474_v7 = vmul.f32 %v804_v44, %v473_v17 }
  0x93   :  { %427 = vxpose.xlu0.b32.cont [14/16] %v411_v34, 128 }
  0x97   :  { %428 = vxpose.xlu0.b32.cont [15/16] %v412_v59, 128 }
  0x9a   :  { %v806_v45 = vpop.eup %805 }
  0x9b   :  { %429 = vxpose.xlu0.b32.end [16/16] %v413_v2, 128  ;;  %v471_v49 = vmul.f32 0.6931472, %v806_v45 }
  0x9d   :  { %v477_v54 = vsel %vm476_vm0, %v474_v7, %v471_v49 }
  0x9e   :  { %v478_v56 = vadd.f32 %v477_v54, %v464_v53 }
  0xa0   :  { %v480_v6 = vmul.f32 %v479_v55, %v478_v56 }
  0xa2   :  { %v481_v51 = vadd.f32 %v480_v6, %v462_v1 }
  0xa4   :  { %482 = vst [vmem:[#allocation3] sm:$0x1] %v481_v51 }
  0xab   :  { %v636_v30 = vld [vmem:[#allocation3] ss:$0 sm:$0xff] }
  0xdb   :  { %v1209_v50 = vpop.trf.xlu0 }
  0xdf   :  { %v1211_v47 = vpop.trf.xlu0 }
  0xe3   :  { %v1213_v25 = vpop.trf.xlu0 }
  0xe7   :  { %v1221_v28 = vpop.trf.xlu0 }
  0xeb   :  { %v434_v62 = vpop.trf.xlu0 }
  0xef   :  { %v435_v3 = vpop.trf.xlu0 }
  0xf3   :  { %v436_v60 = vpop.trf.xlu0 }
  0xf7   :  { %v437_v8 = vpop.trf.xlu0 }
  0xfb   :  { %v438_v0 = vpop.trf.xlu0 }
  0xff   :  { %v439_v10 = vpop.trf.xlu0 }
 0x103   :  { %v440_v63 = vpop.trf.xlu0 }
 0x107   :  { %v441_v13 = vpop.trf.xlu0 }
 0x10b   :  { %v442_v12 = vpop.trf.xlu0 }
 0x10f   :  { %v443_v21 = vpop.trf.xlu0 }
 0x113   :  { %v444_v14 = vpop.trf.xlu0 }
 0x117   :  { %v445_v48 = vpop.trf.xlu0 }
 0x118   :  { %659 = vmatprep.subr.mxu0 %v445_v48  ;;  %700 = vmatprep.subr.mxu1 %v445_v48 }
 0x119   :  { %660 = vmatpush3.msra.mxu0 %v445_v48  ;;  %716 = vmatpush3.msra.mxu1 %v445_v48 }
 0x11a   :  { %661 = vmatprep.subr.mxu0 %v444_v14  ;;  %701 = vmatprep.subr.mxu1 %v444_v14 }
 0x11b   :  { %662 = vmatpush3.msra.mxu0 %v444_v14  ;;  %717 = vmatpush3.msra.mxu1 %v444_v14 }
 0x11c   :  { %663 = vmatprep.subr.mxu0 %v443_v21  ;;  %702 = vmatprep.subr.mxu1 %v443_v21 }
 0x11d   :  { %664 = vmatpush3.msra.mxu0 %v443_v21  ;;  %718 = vmatpush3.msra.mxu1 %v443_v21 }
 0x11e   :  { %665 = vmatprep.subr.mxu0 %v442_v12  ;;  %703 = vmatprep.subr.mxu1 %v442_v12 }
 0x11f   :  { %666 = vmatpush3.msra.mxu0 %v442_v12  ;;  %719 = vmatpush3.msra.mxu1 %v442_v12 }
 0x120   :  { %667 = vmatprep.subr.mxu0 %v441_v13  ;;  %704 = vmatprep.subr.mxu1 %v441_v13 }
 0x121   :  { %668 = vmatpush3.msra.mxu0 %v441_v13  ;;  %720 = vmatpush3.msra.mxu1 %v441_v13 }
 0x122   :  { %669 = vmatprep.subr.mxu0 %v440_v63  ;;  %705 = vmatprep.subr.mxu1 %v440_v63 }
 0x123   :  { %670 = vmatpush3.msra.mxu0 %v440_v63  ;;  %721 = vmatpush3.msra.mxu1 %v440_v63 }
 0x124   :  { %671 = vmatprep.subr.mxu0 %v439_v10  ;;  %706 = vmatprep.subr.mxu1 %v439_v10 }
 0x125   :  { %672 = vmatpush3.msra.mxu0 %v439_v10  ;;  %722 = vmatpush3.msra.mxu1 %v439_v10 }
 0x126   :  { %673 = vmatprep.subr.mxu0 %v438_v0  ;;  %707 = vmatprep.subr.mxu1 %v438_v0 }
 0x127   :  { %674 = vmatpush3.msra.mxu0 %v438_v0  ;;  %723 = vmatpush3.msra.mxu1 %v438_v0 }
 0x128   :  { %675 = vmatprep.subr.mxu0 %v437_v8  ;;  %708 = vmatprep.subr.mxu1 %v437_v8 }
 0x129   :  { %676 = vmatpush3.msra.mxu0 %v437_v8  ;;  %724 = vmatpush3.msra.mxu1 %v437_v8 }
 0x12a   :  { %677 = vmatprep.subr.mxu0 %v436_v60  ;;  %709 = vmatprep.subr.mxu1 %v436_v60 }
 0x12b   :  { %678 = vmatpush3.msra.mxu0 %v436_v60  ;;  %725 = vmatpush3.msra.mxu1 %v436_v60 }
 0x12c   :  { %679 = vmatprep.subr.mxu0 %v435_v3  ;;  %710 = vmatprep.subr.mxu1 %v435_v3 }
 0x12d   :  { %680 = vmatpush3.msra.mxu0 %v435_v3  ;;  %726 = vmatpush3.msra.mxu1 %v435_v3 }
 0x12e   :  { %681 = vmatprep.subr.mxu0 %v434_v62  ;;  %711 = vmatprep.subr.mxu1 %v434_v62 }
 0x12f   :  { %682 = vmatpush3.msra.mxu0 %v434_v62  ;;  %727 = vmatpush3.msra.mxu1 %v434_v62 }
 0x130   :  { %683 = vmatprep.subr.mxu0 %v1221_v28  ;;  %712 = vmatprep.subr.mxu1 %v1221_v28 }
 0x131   :  { %684 = vmatpush3.msra.mxu0 %v1221_v28  ;;  %728 = vmatpush3.msra.mxu1 %v1221_v28 }
 0x132   :  { %685 = vmatprep.subr.mxu0 %v1213_v25  ;;  %713 = vmatprep.subr.mxu1 %v1213_v25 }
 0x133   :  { %686 = vmatpush3.msra.mxu0 %v1213_v25  ;;  %729 = vmatpush3.msra.mxu1 %v1213_v25 }
 0x134   :  { %687 = vmatprep.subr.mxu0 %v1211_v47  ;;  %714 = vmatprep.subr.mxu1 %v1211_v47 }
 0x135   :  { %688 = vmatpush3.msra.mxu0 %v1211_v47  ;;  %730 = vmatpush3.msra.mxu1 %v1211_v47 }
 0x136   :  { %689 = vmatprep.subr.mxu0 %v1209_v50  ;;  %715 = vmatprep.subr.mxu1 %v1209_v50 }
 0x137   :  { %690 = vmatpush3.msra.mxu0 %v1209_v50  ;;  %731 = vmatpush3.msra.mxu1 %v1209_v50 }
 0x138   :  { %695 = vmatmul.mubr.f32.vlgmr.msra.gmra.mxu1 %v486_v11  ;;  %692 = vmatmul.mubr.f32.vlgmr.msra.gmra.mxu0 %v484_v15 }
 0x139   :  { %697 = vmatprep.mubr.f32.mxu1 %v487_v16 }
 0x13c   :  { %698 = vmatmul.mubr.f32.gmra.mxu1 %v488_v58 }
 0x1f8   :  { %v696_v4 = vpop.f32.mrf.mxu1  ;;  %v693_v18 = vpop.f32.mrf.mxu0 }
 0x1f9   :  { %v594_v20 = vadd.f32 %v696_v4, %v636_v30  ;;  %v584_v19 = vadd.f32 %v693_v18, %v636_v30 }
 0x1fa   :  { %v588_v52 = vpop.f32.mrf.mxu1  ;;  %v578_v22 = vpop.f32.mrf.mxu0 }
 0x1fb   :  { %610 = vst [vmem:[#allocation12 + $0x18] sm:$0xff] %v594_v20  ;;  %608 = vst [vmem:[#allocation12 + $0x8] sm:$0xff] %v584_v19  ;;  %v589_v9 = vadd.f32 %v636_v30, %v588_v52  ;;  %v579_v61 = vadd.f32 %v636_v30, %v578_v22 }
 0x1fc   :  { %v699_v31 = vpop.f32.mrf.mxu1 }
 0x1fd   :  { %609 = vst [vmem:[#allocation12 + $0x10] sm:$0xff] %v589_v9  ;;  %607 = vst [vmem:[#allocation12] sm:$0xff] %v579_v61  ;;  %v604_v32 = vadd.f32 %v699_v31, %v636_v30 }
 0x1fe   :  { %v598_v5 = vpop.f32.mrf.mxu1 }
 0x1ff   :  { %612 = vst [vmem:[#allocation12 + $0x28] sm:$0xff] %v604_v32  ;;  %v599_v27 = vadd.f32 %v636_v30, %v598_v5 }
 0x201   :  { %611 = vst [vmem:[#allocation12 + $0x20] sm:$0xff] %v599_v27 }
 0x202   :  { %898 = shalt.err (!%p895_p10)
}
 0x203   :  { %628 = dma.vmem_to_hbm [thread:$0]  %s623_s6, 768, %s1252_s7, [#allocation6], %s917_s29, %s917_s29, %s918_s30  }
 0x204   :  { %913 = dma.done.wait [#allocation6], 768  }
 0x205   :  { %914 = vsyncadd [#allocation6], 4294966528 }
 0x206   :  { %632 = vsyncpa [#allocation5], 1 }
 0x207   :  { %633 = vsyncpa [#allocation8], 1 }
 0x208   :  { %634 = vsyncpa [#allocation11], 1 }
 0x209   :  { %635 = vsyncpa [#allocation6], 1 }

</bundles_post_ra>
